<compile_context>
chip_gen: v7x
topology: tpu7x:2x2x1
jax: 0.10.0
libtpu: 0.0.40
codegen_flags: <defaults>
</compile_context>

<pallas_src>
import math
import functools

import jax
import jax.numpy as jnp
import numpy as np
from jax import lax
from jax.experimental import pallas as pl
from jax.experimental.pallas import tpu as pltpu

NEG_SLOPE = 0.2
ACT_SCALE = math.sqrt(2.0)

_LANE = 128                                   # output-channel padding (lane-dense stores)
_BATCH_BLOCK_VMEM_BUDGET = 16 * 1024 * 1024   # per-step streamed-buffer budget


# ---------------------------------------------------------------------------
# Blur (upfirdn2d) kernel constant: make_kernel([1,3,3,1]), flipped (symmetric).
# ---------------------------------------------------------------------------
def _make_blur_kernel(k1d=(1.0, 3.0, 3.0, 1.0)):
    k = np.asarray(k1d, np.float32)
    k2 = np.outer(k, k)
    k2 = k2 / k2.sum()
    return np.ascontiguousarray(k2[::-1, ::-1])


BLUR_K_FLIPPED = _make_blur_kernel()


def _round_up(x, m):
    return ((x + m - 1) // m) * m


@functools.lru_cache(maxsize=1)
def _vmem_limit_bytes(default=48 * 1024 * 1024):
    """Raised VMEM budget, capped to 3/4 of the chip's physical VMEM (v7x safe)."""
    try:
        cap = int(pltpu.get_tpu_info().vmem_capacity_bytes)
        return int(min(default, (cap * 3) // 4))
    except Exception:
        return None  # fall back to the compiler default


# ---------------------------------------------------------------------------
# Pallas kernel: stride-1 "valid" conv on a pre-padded NHWC input, realized as
# per-tap matmuls with an f32 VMEM accumulator.  Fused bias + leaky_relu +
# residual add in the finalize branch.
# ---------------------------------------------------------------------------
def _build_conv_kernel(nb, kh, kw, wo, activate, with_bias, with_skip, residual_gain):
    def kernel(*refs):
        x_ref, w_ref = refs[0], refs[1]
        idx = 2
        b_ref = s_ref = None
        if with_bias:
            b_ref = refs[idx]; idx += 1
        if with_skip:
            s_ref = refs[idx]; idx += 1
        o_ref = refs[idx]
        acc_ref = refs[idx + 1]

        r = pl.program_id(2)  # kernel-row tap (reduction axis, innermost)

        @pl.when(r == 0)
        def _init():
            acc_ref[...] = jnp.zeros_like(acc_ref)

        # One input row block (nb, 1, Wp, Cin) is in VMEM; reuse it for all kw
        # column taps.  Weights are fully resident; index the tap dynamically.
        for n in range(nb):
            part = None
            for s in range(kw):
                xs = x_ref[n, 0, pl.ds(s, wo), :]        # (Wo, Cin)   bf16
                wt = w_ref[r * kw + s]                   # (Cin, Coutp) bf16
                d = jnp.dot(xs, wt, preferred_element_type=jnp.float32)
                part = d if part is None else part + d
            acc_ref[n] = acc_ref[n] + part

        @pl.when(r == kh - 1)
        def _finalize():
            z = acc_ref[...]                             # (nb, Wo, Coutp) f32
            if with_bias:
                z = z + b_ref[...]                       # (1, 1, Coutp) broadcast
            if activate:
                z = jnp.where(z >= 0, z, NEG_SLOPE * z)
            if with_skip:
                if residual_gain != 1.0:
                    z = z * residual_gain
                z = z + s_ref[...][:, 0].astype(jnp.float32)
            o_ref[...] = z[:, None].astype(o_ref.dtype)  # (nb, 1, Wo, Coutp)

    return kernel


def conv2d_tap(xp, w_taps, kh, kw, bias=None, skip=None, activate=False,
               residual_gain=1.0, out_dtype=jnp.bfloat16):
    """Stride-1 valid conv of the pre-padded NHWC input `xp` with tap weights
    `w_taps` of shape (kh*kw, Cin, Coutp); Coutp must be a multiple of 128.
    Returns (N, Ho, Wo, Coutp) in `out_dtype`."""
    N, Hp, Wp, Cin = xp.shape
    T, Cin_w, Coutp = w_taps.shape
    assert T == kh * kw and Cin_w == Cin and Coutp % _LANE == 0
    Ho = Hp - kh + 1
    Wo = Wp - kw + 1
    out_isz = jnp.dtype(out_dtype).itemsize
    with_bias = bias is not None
    with_skip = skip is not None

    # Batch block: largest divisor of N whose streamed buffers fit the budget.
    def vmem_est(nb):
        return (2 * nb * Wp * Cin * 2                       # x row block (2 bufs)
                + 2 * nb * Wo * Coutp * out_isz             # output block
                + (2 * nb * Wo * Coutp * 2 if with_skip else 0)
                + nb * Wo * Coutp * 4)                      # f32 accumulator
    nb = N
    while nb > 1 and (N % nb != 0 or vmem_est(nb) > _BATCH_BLOCK_VMEM_BUDGET):
        nb -= 1

    grid = (N // nb, Ho, kh)

    inputs = [xp, w_taps]
    in_specs = [
        # one padded input row per (oy, tap-row) step
        pl.BlockSpec((nb, 1, Wp, Cin), lambda b, oy, r: (b, oy + r, 0, 0)),
        # whole tap-weight tensor resident in VMEM (constant block index)
        pl.BlockSpec((T, Cin, Coutp), lambda b, oy, r: (0, 0, 0)),
    ]
    if with_bias:
        inputs.append(bias.reshape(1, 1, Coutp).astype(jnp.float32))
        in_specs.append(pl.BlockSpec((1, 1, Coutp), lambda b, oy, r: (0, 0, 0)))
    if with_skip:
        assert skip.shape == (N, Ho, Wo, Coutp)
        inputs.append(skip.astype(jnp.bfloat16))
        in_specs.append(pl.BlockSpec((nb, 1, Wo, Coutp), lambda b, oy, r: (b, oy, 0, 0)))

    flops = 2 * N * Ho * Wo * kh * kw * Cin * Coutp
    bytes_accessed = (N * Ho * kh * Wp * Cin * 2            # each row read kh times
                      + int(w_taps.size) * 2
                      + (N * Ho * Wo * Coutp * 2 if with_skip else 0)
                      + N * Ho * Wo * Coutp * out_isz)
    cost = pl.CostEstimate(flops=int(flops), transcendentals=0,
                           bytes_accessed=int(bytes_accessed))

    return pl.pallas_call(
        _build_conv_kernel(nb, kh, kw, Wo, activate, with_bias, with_skip,
                           float(residual_gain)),
        out_shape=jax.ShapeDtypeStruct((N, Ho, Wo, Coutp), out_dtype),
        grid_spec=pltpu.PrefetchScalarGridSpec(
            num_scalar_prefetch=0,
            grid=grid,
            in_specs=in_specs,
            out_specs=pl.BlockSpec((nb, 1, Wo, Coutp), lambda b, oy, r: (b, oy, 0, 0)),
            scratch_shapes=[pltpu.VMEM((nb, Wo, Coutp), jnp.float32)],
        ),
        compiler_params=pltpu.CompilerParams(
            dimension_semantics=("parallel", "parallel", "arbitrary"),
            vmem_limit_bytes=_vmem_limit_bytes(),
        ),
        cost_estimate=cost,
    )(*inputs)


# ---------------------------------------------------------------------------
# Trace-time (XLA) glue: padding, space-to-depth, weight rearrangement, blur fold.
# ---------------------------------------------------------------------------
def _pad_hw(x, pad):
    if pad == 0:
        return x
    return jnp.pad(x, ((0, 0), (pad, pad), (pad, pad), (0, 0)))


def _space_to_depth(x):
    """NHWC, even H/W: x[n, 2i+dy, 2j+dx, c] -> y[n, i, j, (dy*2+dx)*C + c]."""
    N, H, W, C = x.shape
    assert H % 2 == 0 and W % 2 == 0
    x = x.reshape(N, H // 2, 2, W // 2, 2, C)
    x = jnp.transpose(x, (0, 1, 3, 2, 4, 5))
    return x.reshape(N, H // 2, W // 2, 4 * C)


def _s2d_weight(w_oihw):
    """(O, C, K, K) stride-2 conv -> (O, 4C, K/2, K/2) stride-1 conv on the
    space-to-depth input (exact index rearrangement)."""
    O, C, K, K2 = w_oihw.shape
    assert K == K2 and K % 2 == 0
    w = w_oihw.reshape(O, C, K // 2, 2, K // 2, 2)      # (o, c, i, dy, j, dx)
    w = jnp.transpose(w, (0, 3, 5, 1, 2, 4))            # (o, dy, dx, c, i, j)
    return w.reshape(O, 4 * C, K // 2, K // 2)


def _weight_taps(w_oihw, coutp):
    """(O, I, kh, kw) -> (kh*kw, I, coutp) tap-major bf16, zero-padded cout."""
    O, I, kh, kw = w_oihw.shape
    w = jnp.transpose(w_oihw, (2, 3, 1, 0)).reshape(kh * kw, I, O)
    if coutp > O:
        w = jnp.pad(w, ((0, 0), (0, 0), (0, coutp - O)))
    return w.astype(jnp.bfloat16)


def fuse_blur_into_conv(w_oihw, blur2d):
    """blur(pad) followed by a conv == one conv with the blur-expanded filter."""
    O, I, kh, kw = w_oihw.shape
    bh, bw = blur2d.shape
    b = jnp.asarray(blur2d, w_oihw.dtype)[None, None]
    out = jnp.zeros((O, I, kh + bh - 1, kw + bw - 1), w_oihw.dtype)
    for r in range(kh):
        for s in range(kw):
            out = out.at[:, :, r:r + bh, s:s + bw].add(
                w_oihw[:, :, r:r + 1, s:s + 1] * b)
    return out


# ---------------------------------------------------------------------------
# ResBlock forward (downsample=True)
# ---------------------------------------------------------------------------
def resblock_forward(x_nchw, params, skip_gain=1.0):
    x = jnp.transpose(x_nchw, (0, 2, 3, 1)).astype(jnp.bfloat16)  # NCHW -> NHWC
    N, H, W, Cin = x.shape
    assert H % 2 == 0 and W % 2 == 0, "downsample path assumes even spatial dims"
    Cout = params["conv2_w"].shape[0]
    inv_norm = 1.0 / math.sqrt(skip_gain ** 2 + 1.0)
    blur = jnp.asarray(BLUR_K_FLIPPED)

    Cmidp = _round_up(Cin, _LANE)   # conv1 output channel padding (lane-dense)
    Coutp = _round_up(Cout, _LANE)  # conv2 / skip output channel padding

    # --- trace-time weight prep (all folds exact: leaky_relu is positively
    #     homogeneous; sqrt(2), inv_norm, skip_gain>0 are folded pre-activation)
    w1 = _weight_taps(params["conv1_w"] * (params["conv1_scale"] * ACT_SCALE), Cmidp)
    b1 = jnp.pad(params["conv1_act_bias"] * ACT_SCALE, (0, Cmidp - Cin))

    res_gain = float(skip_gain)
    if res_gain > 0.0:
        post = ACT_SCALE * inv_norm * res_gain
        kernel_res_gain = 1.0
    else:  # cannot fold a non-positive gain through leaky_relu
        post = ACT_SCALE * inv_norm
        kernel_res_gain = res_gain
    w2f = fuse_blur_into_conv(params["conv2_w"], blur)            # (Cout, Cin, 6, 6)
    w2 = _weight_taps(_s2d_weight(w2f) * (params["conv2_scale"] * post), Coutp)
    b2 = jnp.pad(params["conv2_act_bias"] * post, (0, Coutp - Cout))

    wsf = fuse_blur_into_conv(params["skip_w"], blur)             # (Cout, Cin, 4, 4)
    ws = _weight_taps(_s2d_weight(wsf) * (params["skip_scale"] * inv_norm), Coutp)

    # --- conv1: 3x3 stride 1 pad 1, fused bias + leaky_relu (*sqrt2 folded) ----
    o1p = conv2d_tap(_pad_hw(x, 1), w1, 3, 3, bias=b1, activate=True)
    o1 = o1p[..., :Cin]                                           # drop channel pad

    # --- skip: blur+1x1 s2 folded -> 4x4 s2 -> (s2d) 2x2 stride-1, no bias/act -
    xs = _space_to_depth(_pad_hw(x, 1))                           # (N,(H+2)/2,(W+2)/2,4Cin)
    skip_p = conv2d_tap(xs, ws, 2, 2, bias=None, activate=False)

    # --- conv2: blur+3x3 s2 folded -> 6x6 s2 -> (s2d) 3x3 stride-1,
    #     fused bias + leaky_relu + residual add in the kernel epilogue --------
    x2 = _space_to_depth(_pad_hw(o1, 2))                          # (N,(H+4)/2,(W+4)/2,4Cin)
    o2 = conv2d_tap(x2, w2, 3, 3, bias=b2, activate=True,
                    skip=skip_p, residual_gain=kernel_res_gain)

    out = o2[..., :Cout]                                          # bf16, drop channel pad
    out = jnp.transpose(out, (0, 3, 1, 2))                        # NHWC -> NCHW (bf16)
    return out.astype(jnp.float32)


# ---------------------------------------------------------------------------
# Pure-JAX f32 reference (faithful to the torch module) for verification
# ---------------------------------------------------------------------------
def resblock_reference(x, params, skip_gain=1.0):
    dn = ("NCHW", "OIHW", "NCHW")
    hi = lax.Precision.HIGHEST
    Cin = x.shape[1]

    def leaky(y, bias):
        y = y + bias.reshape(1, -1, 1, 1)
        return jnp.where(y >= 0, y, NEG_SLOPE * y) * ACT_SCALE

    kdw = jnp.tile(jnp.asarray(BLUR_K_FLIPPED)[None, None], (Cin, 1, 1, 1))

    y = lax.conv_general_dilated(x, params["conv1_w"] * params["conv1_scale"],
                                 (1, 1), ((1, 1), (1, 1)),
                                 dimension_numbers=dn, precision=hi)
    y = leaky(y, params["conv1_act_bias"])
    yb = lax.conv_general_dilated(y, kdw, (1, 1), ((2, 2), (2, 2)),
                                  dimension_numbers=dn,
                                  feature_group_count=Cin, precision=hi)
    y2 = lax.conv_general_dilated(yb, params["conv2_w"] * params["conv2_scale"],
                                  (2, 2), ((0, 0), (0, 0)),
                                  dimension_numbers=dn, precision=hi)
    y2 = leaky(y2, params["conv2_act_bias"])
    xb = lax.conv_general_dilated(x, kdw, (1, 1), ((1, 1), (1, 1)),
                                  dimension_numbers=dn,
                                  feature_group_count=Cin, precision=hi)
    sk = lax.conv_general_dilated(xb, params["skip_w"] * params["skip_scale"],
                                  (2, 2), ((0, 0), (0, 0)),
                                  dimension_numbers=dn, precision=hi)
    return (y2 * skip_gain + sk) / math.sqrt(skip_gain ** 2 + 1.0)


# ---------------------------------------------------------------------------
if __name__ == "__main__":
    N, Cin, Cout, H, W = 2, 4, 8, 16, 16
    key = jax.random.PRNGKey(0)
    kx, k1, k2, k3 = jax.random.split(key, 4)

    x = jax.random.normal(kx, (N, Cin, H, W), jnp.float32)
    params = dict(
        conv1_w=jax.random.normal(k1, (Cin, Cin, 3, 3), jnp.float32),
        conv1_scale=1.0 / math.sqrt(Cin * 3 * 3),
        conv1_act_bias=jnp.zeros((Cin,), jnp.float32),   # FusedLeakyReLU bias
        conv2_w=jax.random.normal(k2, (Cout, Cin, 3, 3), jnp.float32),
        conv2_scale=1.0 / math.sqrt(Cin * 3 * 3),
        conv2_act_bias=jnp.zeros((Cout,), jnp.float32),  # FusedLeakyReLU bias
        skip_w=jax.random.normal(k3, (Cout, Cin, 1, 1), jnp.float32),
        skip_scale=1.0 / math.sqrt(Cin * 1 * 1),
    )

    forward = jax.jit(functools.partial(resblock_forward, skip_gain=1.0))
    out = jax.block_until_ready(forward(x, params))
    assert out.shape == (N, Cout, H // 2, W // 2), out.shape

    ref = jax.block_until_ready(resblock_reference(x, params, skip_gain=1.0))
    # bf16 activations/weights vs f32 reference -> slightly loosened tolerance.
    np.testing.assert_allclose(np.asarray(out), np.asarray(ref), rtol=5e-2, atol=5e-2)

    print("KERNEL_OK")
</pallas_src>

<mosaic_0001>
module attributes {stable_mosaic.version = 11 : i64} {
  func.func @kernel(%arg0: i32, %arg1: i32, %arg2: i32, %arg3: memref<2x1x18x4xbf16, #tpu.memory_space<vmem>>, %arg4: memref<9x4x128xbf16, #tpu.memory_space<vmem>>, %arg5: memref<1x1x128xf32, #tpu.memory_space<vmem>>, %arg6: memref<2x1x16x128xbf16, #tpu.memory_space<vmem>>, %arg7: memref<2x16x128xf32, #tpu.memory_space<vmem>>) attributes {dimension_semantics = [#tpu.dimension_semantics<parallel>, #tpu.dimension_semantics<parallel>, #tpu.dimension_semantics<arbitrary>], iteration_bounds = array<i64: 1, 16, 3>, scalar_prefetch = 0 : i64, scratch_operands = 1 : i64, tpu.core_type = #tpu.core_type<tc>, window_params = [{transform_indices = @transform_0, window_bounds = array<i64: 2, 1, 18, 4>}, {pipeline_mode = #tpu.pipeline_mode<synchronous>, transform_indices = @transform_1, window_bounds = array<i64: 9, 4, 128>}, {pipeline_mode = #tpu.pipeline_mode<synchronous>, transform_indices = @transform_2, window_bounds = array<i64: 1, 1, 128>}, {transform_indices = @transform_3, window_bounds = array<i64: 2, 1, 16, 128>}]} {
    %c0_i32 = arith.constant 0 : i32
    %0 = arith.cmpi eq, %arg2, %c0_i32 : i32
    %1 = arith.extui %0 : i1 to i32
    %c0_i32_0 = arith.constant 0 : i32
    %2 = arith.cmpi ne, %1, %c0_i32_0 : i32
    scf.if %2 {
      %cst_62 = arith.constant 0.000000e+00 : f32
      %70 = vector.broadcast %cst_62 : f32 to vector<2x16x128xf32>
      %c0_63 = arith.constant 0 : index
      %c0_64 = arith.constant 0 : index
      %c0_65 = arith.constant 0 : index
      %71 = vector.load %arg7[%c0_63, %c0_64, %c0_65] : memref<2x16x128xf32, #tpu.memory_space<vmem>>, vector<2x16x128xf32>
      tpu.vector_store %arg7[%c0_63, %c0_64, %c0_65], %70 {strides = array<i32>} : memref<2x16x128xf32, #tpu.memory_space<vmem>>, vector<2x16x128xf32>,
    } else {
    }
    %c0 = arith.constant 0 : index
    %c0_1 = arith.constant 0 : index
    %c0_2 = arith.constant 0 : index
    %c0_3 = arith.constant 0 : index
    %3 = vector.load %arg3[%c0, %c0_1, %c0_2, %c0_3] : memref<2x1x18x4xbf16, #tpu.memory_space<vmem>>, vector<1x1x16x4xbf16>
    %4 = vector.shape_cast %3 : vector<1x1x16x4xbf16> to vector<16x4xbf16>
    %c3_i32 = arith.constant 3 : i32
    %5 = arith.muli %arg2, %c3_i32 : i32
    %c0_i32_4 = arith.constant 0 : i32
    %6 = arith.addi %5, %c0_i32_4 : i32
    %7 = arith.index_cast %6 : i32 to index
    %c0_5 = arith.constant 0 : index
    %c0_6 = arith.constant 0 : index
    %8 = vector.load %arg4[%7, %c0_5, %c0_6] : memref<9x4x128xbf16, #tpu.memory_space<vmem>>, vector<1x4x128xbf16>
    %9 = vector.shape_cast %8 : vector<1x4x128xbf16> to vector<4x128xbf16>
    %cst = arith.constant dense<0.000000e+00> : vector<16x128xf32>
    %10 = tpu.matmul %4, %9, %cst {dimension_numbers = #tpu.dot_dimension_numbers<[1], [0], [0], [1], [0, 0, 1, 1], [], []>} : vector<16x4xbf16>, vector<4x128xbf16>, vector<16x128xf32> -> vector<16x128xf32>
    %c0_7 = arith.constant 0 : index
    %c0_8 = arith.constant 0 : index
    %c1 = arith.constant 1 : index
    %c0_9 = arith.constant 0 : index
    %11 = vector.load %arg3[%c0_7, %c0_8, %c1, %c0_9] : memref<2x1x18x4xbf16, #tpu.memory_space<vmem>>, vector<1x1x16x4xbf16>
    %12 = vector.shape_cast %11 : vector<1x1x16x4xbf16> to vector<16x4xbf16>
    %c3_i32_10 = arith.constant 3 : i32
    %13 = arith.muli %arg2, %c3_i32_10 : i32
    %c1_i32 = arith.constant 1 : i32
    %14 = arith.addi %13, %c1_i32 : i32
    %15 = arith.index_cast %14 : i32 to index
    %c0_11 = arith.constant 0 : index
    %c0_12 = arith.constant 0 : index
    %16 = vector.load %arg4[%15, %c0_11, %c0_12] : memref<9x4x128xbf16, #tpu.memory_space<vmem>>, vector<1x4x128xbf16>
    %17 = vector.shape_cast %16 : vector<1x4x128xbf16> to vector<4x128xbf16>
    %cst_13 = arith.constant dense<0.000000e+00> : vector<16x128xf32>
    %18 = tpu.matmul %12, %17, %cst_13 {dimension_numbers = #tpu.dot_dimension_numbers<[1], [0], [0], [1], [0, 0, 1, 1], [], []>} : vector<16x4xbf16>, vector<4x128xbf16>, vector<16x128xf32> -> vector<16x128xf32>
    %19 = arith.addf %10, %18 : vector<16x128xf32>
    %c0_14 = arith.constant 0 : index
    %c0_15 = arith.constant 0 : index
    %c2 = arith.constant 2 : index
    %c0_16 = arith.constant 0 : index
    %20 = vector.load %arg3[%c0_14, %c0_15, %c2, %c0_16] : memref<2x1x18x4xbf16, #tpu.memory_space<vmem>>, vector<1x1x16x4xbf16>
    %21 = vector.shape_cast %20 : vector<1x1x16x4xbf16> to vector<16x4xbf16>
    %c3_i32_17 = arith.constant 3 : i32
    %22 = arith.muli %arg2, %c3_i32_17 : i32
    %c2_i32 = arith.constant 2 : i32
    %23 = arith.addi %22, %c2_i32 : i32
    %24 = arith.index_cast %23 : i32 to index
    %c0_18 = arith.constant 0 : index
    %c0_19 = arith.constant 0 : index
    %25 = vector.load %arg4[%24, %c0_18, %c0_19] : memref<9x4x128xbf16, #tpu.memory_space<vmem>>, vector<1x4x128xbf16>
    %26 = vector.shape_cast %25 : vector<1x4x128xbf16> to vector<4x128xbf16>
    %cst_20 = arith.constant dense<0.000000e+00> : vector<16x128xf32>
    %27 = tpu.matmul %21, %26, %cst_20 {dimension_numbers = #tpu.dot_dimension_numbers<[1], [0], [0], [1], [0, 0, 1, 1], [], []>} : vector<16x4xbf16>, vector<4x128xbf16>, vector<16x128xf32> -> vector<16x128xf32>
    %28 = arith.addf %19, %27 : vector<16x128xf32>
    %c0_21 = arith.constant 0 : index
    %c0_22 = arith.constant 0 : index
    %c0_23 = arith.constant 0 : index
    %29 = vector.load %arg7[%c0_21, %c0_22, %c0_23] : memref<2x16x128xf32, #tpu.memory_space<vmem>>, vector<1x16x128xf32>
    %30 = vector.shape_cast %29 : vector<1x16x128xf32> to vector<16x128xf32>
    %31 = arith.addf %30, %28 : vector<16x128xf32>
    %c0_24 = arith.constant 0 : index
    %c0_25 = arith.constant 0 : index
    %c0_26 = arith.constant 0 : index
    %32 = vector.load %arg7[%c0_24, %c0_25, %c0_26] : memref<2x16x128xf32, #tpu.memory_space<vmem>>, vector<1x16x128xf32>
    %33 = vector.shape_cast %32 : vector<1x16x128xf32> to vector<16x128xf32>
    %34 = vector.shape_cast %31 : vector<16x128xf32> to vector<1x16x128xf32>
    tpu.vector_store %arg7[%c0_24, %c0_25, %c0_26], %34 {strides = array<i32>} : memref<2x16x128xf32, #tpu.memory_space<vmem>>, vector<1x16x128xf32>,
    %c1_27 = arith.constant 1 : index
    %c0_28 = arith.constant 0 : index
    %c0_29 = arith.constant 0 : index
    %c0_30 = arith.constant 0 : index
    %35 = vector.load %arg3[%c1_27, %c0_28, %c0_29, %c0_30] : memref<2x1x18x4xbf16, #tpu.memory_space<vmem>>, vector<1x1x16x4xbf16>
    %36 = vector.shape_cast %35 : vector<1x1x16x4xbf16> to vector<16x4xbf16>
    %c3_i32_31 = arith.constant 3 : i32
    %37 = arith.muli %arg2, %c3_i32_31 : i32
    %c0_i32_32 = arith.constant 0 : i32
    %38 = arith.addi %37, %c0_i32_32 : i32
    %39 = arith.index_cast %38 : i32 to index
    %c0_33 = arith.constant 0 : index
    %c0_34 = arith.constant 0 : index
    %40 = vector.load %arg4[%39, %c0_33, %c0_34] : memref<9x4x128xbf16, #tpu.memory_space<vmem>>, vector<1x4x128xbf16>
    %41 = vector.shape_cast %40 : vector<1x4x128xbf16> to vector<4x128xbf16>
    %cst_35 = arith.constant dense<0.000000e+00> : vector<16x128xf32>
    %42 = tpu.matmul %36, %41, %cst_35 {dimension_numbers = #tpu.dot_dimension_numbers<[1], [0], [0], [1], [0, 0, 1, 1], [], []>} : vector<16x4xbf16>, vector<4x128xbf16>, vector<16x128xf32> -> vector<16x128xf32>
    %c1_36 = arith.constant 1 : index
    %c0_37 = arith.constant 0 : index
    %c1_38 = arith.constant 1 : index
    %c0_39 = arith.constant 0 : index
    %43 = vector.load %arg3[%c1_36, %c0_37, %c1_38, %c0_39] : memref<2x1x18x4xbf16, #tpu.memory_space<vmem>>, vector<1x1x16x4xbf16>
    %44 = vector.shape_cast %43 : vector<1x1x16x4xbf16> to vector<16x4xbf16>
    %c3_i32_40 = arith.constant 3 : i32
    %45 = arith.muli %arg2, %c3_i32_40 : i32
    %c1_i32_41 = arith.constant 1 : i32
    %46 = arith.addi %45, %c1_i32_41 : i32
    %47 = arith.index_cast %46 : i32 to index
    %c0_42 = arith.constant 0 : index
    %c0_43 = arith.constant 0 : index
    %48 = vector.load %arg4[%47, %c0_42, %c0_43] : memref<9x4x128xbf16, #tpu.memory_space<vmem>>, vector<1x4x128xbf16>
    %49 = vector.shape_cast %48 : vector<1x4x128xbf16> to vector<4x128xbf16>
    %cst_44 = arith.constant dense<0.000000e+00> : vector<16x128xf32>
    %50 = tpu.matmul %44, %49, %cst_44 {dimension_numbers = #tpu.dot_dimension_numbers<[1], [0], [0], [1], [0, 0, 1, 1], [], []>} : vector<16x4xbf16>, vector<4x128xbf16>, vector<16x128xf32> -> vector<16x128xf32>
    %51 = arith.addf %42, %50 : vector<16x128xf32>
    %c1_45 = arith.constant 1 : index
    %c0_46 = arith.constant 0 : index
    %c2_47 = arith.constant 2 : index
    %c0_48 = arith.constant 0 : index
    %52 = vector.load %arg3[%c1_45, %c0_46, %c2_47, %c0_48] : memref<2x1x18x4xbf16, #tpu.memory_space<vmem>>, vector<1x1x16x4xbf16>
    %53 = vector.shape_cast %52 : vector<1x1x16x4xbf16> to vector<16x4xbf16>
    %c3_i32_49 = arith.constant 3 : i32
    %54 = arith.muli %arg2, %c3_i32_49 : i32
    %c2_i32_50 = arith.constant 2 : i32
    %55 = arith.addi %54, %c2_i32_50 : i32
    %56 = arith.index_cast %55 : i32 to index
    %c0_51 = arith.constant 0 : index
    %c0_52 = arith.constant 0 : index
    %57 = vector.load %arg4[%56, %c0_51, %c0_52] : memref<9x4x128xbf16, #tpu.memory_space<vmem>>, vector<1x4x128xbf16>
    %58 = vector.shape_cast %57 : vector<1x4x128xbf16> to vector<4x128xbf16>
    %cst_53 = arith.constant dense<0.000000e+00> : vector<16x128xf32>
    %59 = tpu.matmul %53, %58, %cst_53 {dimension_numbers = #tpu.dot_dimension_numbers<[1], [0], [0], [1], [0, 0, 1, 1], [], []>} : vector<16x4xbf16>, vector<4x128xbf16>, vector<16x128xf32> -> vector<16x128xf32>
    %60 = arith.addf %51, %59 : vector<16x128xf32>
    %c1_54 = arith.constant 1 : index
    %c0_55 = arith.constant 0 : index
    %c0_56 = arith.constant 0 : index
    %61 = vector.load %arg7[%c1_54, %c0_55, %c0_56] : memref<2x16x128xf32, #tpu.memory_space<vmem>>, vector<1x16x128xf32>
    %62 = vector.shape_cast %61 : vector<1x16x128xf32> to vector<16x128xf32>
    %63 = arith.addf %62, %60 : vector<16x128xf32>
    %c1_57 = arith.constant 1 : index
    %c0_58 = arith.constant 0 : index
    %c0_59 = arith.constant 0 : index
    %64 = vector.load %arg7[%c1_57, %c0_58, %c0_59] : memref<2x16x128xf32, #tpu.memory_space<vmem>>, vector<1x16x128xf32>
    %65 = vector.shape_cast %64 : vector<1x16x128xf32> to vector<16x128xf32>
    %66 = vector.shape_cast %63 : vector<16x128xf32> to vector<1x16x128xf32>
    tpu.vector_store %arg7[%c1_57, %c0_58, %c0_59], %66 {strides = array<i32>} : memref<2x16x128xf32, #tpu.memory_space<vmem>>, vector<1x16x128xf32>,
    %c2_i32_60 = arith.constant 2 : i32
    %67 = arith.cmpi eq, %arg2, %c2_i32_60 : i32
    %68 = arith.extui %67 : i1 to i32
    %c0_i32_61 = arith.constant 0 : i32
    %69 = arith.cmpi ne, %68, %c0_i32_61 : i32
    scf.if %69 {
      %c0_62 = arith.constant 0 : index
      %c0_63 = arith.constant 0 : index
      %c0_64 = arith.constant 0 : index
      %70 = vector.load %arg7[%c0_62, %c0_63, %c0_64] : memref<2x16x128xf32, #tpu.memory_space<vmem>>, vector<2x16x128xf32>
      %c0_65 = arith.constant 0 : index
      %c0_66 = arith.constant 0 : index
      %c0_67 = arith.constant 0 : index
      %71 = vector.load %arg5[%c0_65, %c0_66, %c0_67] : memref<1x1x128xf32, #tpu.memory_space<vmem>>, vector<1x1x128xf32>
      %72 = vector.broadcast %71 : vector<1x1x128xf32> to vector<2x16x128xf32>
      %73 = arith.addf %70, %72 : vector<2x16x128xf32>
      %cst_68 = arith.constant 0.000000e+00 : f32
      %74 = vector.broadcast %cst_68 : f32 to vector<2x16x128xf32>
      %75 = arith.cmpf oge, %73, %74 : vector<2x16x128xf32>
      %cst_69 = arith.constant 2.000000e-01 : f32
      %76 = vector.broadcast %cst_69 : f32 to vector<2x16x128xf32>
      %77 = arith.mulf %76, %73 : vector<2x16x128xf32>
      %78 = arith.select %75, %73, %77 : vector<2x16x128xi1>, vector<2x16x128xf32>
      %79 = vector.shape_cast %78 : vector<2x16x128xf32> to vector<2x1x16x128xf32>
      %80 = arith.truncf %79 : vector<2x1x16x128xf32> to vector<2x1x16x128xbf16>
      %c0_70 = arith.constant 0 : index
      %c0_71 = arith.constant 0 : index
      %c0_72 = arith.constant 0 : index
      %c0_73 = arith.constant 0 : index
      %81 = vector.load %arg6[%c0_70, %c0_71, %c0_72, %c0_73] : memref<2x1x16x128xbf16, #tpu.memory_space<vmem>>, vector<2x1x16x128xbf16>
      tpu.vector_store %arg6[%c0_70, %c0_71, %c0_72, %c0_73], %80 {strides = array<i32>} : memref<2x1x16x128xbf16, #tpu.memory_space<vmem>>, vector<2x1x16x128xbf16>,
    } else {
    }
    return
  }
  func.func @transform_0(%arg0: i32, %arg1: i32, %arg2: i32) -> (i32, i32, i32, i32) {
    %0 = arith.addi %arg1, %arg2 : i32
    %c0_i32 = arith.constant 0 : i32
    %c0_i32_0 = arith.constant 0 : i32
    %c0_i32_1 = arith.constant 0 : i32
    return %arg0, %0, %c0_i32, %c0_i32_0 : i32, i32, i32, i32
  }
  func.func @transform_1(%arg0: i32, %arg1: i32, %arg2: i32) -> (i32, i32, i32) {
    %c0_i32 = arith.constant 0 : i32
    %c0_i32_0 = arith.constant 0 : i32
    %c0_i32_1 = arith.constant 0 : i32
    %c0_i32_2 = arith.constant 0 : i32
    return %c0_i32, %c0_i32_0, %c0_i32_1 : i32, i32, i32
  }
  func.func @transform_2(%arg0: i32, %arg1: i32, %arg2: i32) -> (i32, i32, i32) {
    %c0_i32 = arith.constant 0 : i32
    %c0_i32_0 = arith.constant 0 : i32
    %c0_i32_1 = arith.constant 0 : i32
    %c0_i32_2 = arith.constant 0 : i32
    return %c0_i32, %c0_i32_0, %c0_i32_1 : i32, i32, i32
  }
  func.func @transform_3(%arg0: i32, %arg1: i32, %arg2: i32) -> (i32, i32, i32, i32) {
    %c0_i32 = arith.constant 0 : i32
    %c0_i32_0 = arith.constant 0 : i32
    %c0_i32_1 = arith.constant 0 : i32
    return %arg0, %arg1, %c0_i32, %c0_i32_0 : i32, i32, i32, i32
  }
}

module attributes {stable_mosaic.version = 11 : i64} {
  func.func @kernel(%arg0: i32, %arg1: i32, %arg2: i32, %arg3: memref<2x1x10x16xbf16, #tpu.memory_space<vmem>>, %arg4: memref<9x16x128xbf16, #tpu.memory_space<vmem>>, %arg5: memref<1x1x128xf32, #tpu.memory_space<vmem>>, %arg6: memref<2x1x8x128xbf16, #tpu.memory_space<vmem>>, %arg7: memref<2x1x8x128xbf16, #tpu.memory_space<vmem>>, %arg8: memref<2x8x128xf32, #tpu.memory_space<vmem>>) attributes {dimension_semantics = [#tpu.dimension_semantics<parallel>, #tpu.dimension_semantics<parallel>, #tpu.dimension_semantics<arbitrary>], iteration_bounds = array<i64: 1, 8, 3>, scalar_prefetch = 0 : i64, scratch_operands = 1 : i64, tpu.core_type = #tpu.core_type<tc>, window_params = [{transform_indices = @transform_0, window_bounds = array<i64: 2, 1, 10, 16>}, {pipeline_mode = #tpu.pipeline_mode<synchronous>, transform_indices = @transform_1, window_bounds = array<i64: 9, 16, 128>}, {pipeline_mode = #tpu.pipeline_mode<synchronous>, transform_indices = @transform_2, window_bounds = array<i64: 1, 1, 128>}, {transform_indices = @transform_3, window_bounds = array<i64: 2, 1, 8, 128>}, {transform_indices = @transform_4, window_bounds = array<i64: 2, 1, 8, 128>}]} {
    %c0_i32 = arith.constant 0 : i32
    %0 = arith.cmpi eq, %arg2, %c0_i32 : i32
    %1 = arith.extui %0 : i1 to i32
    %c0_i32_0 = arith.constant 0 : i32
    %2 = arith.cmpi ne, %1, %c0_i32_0 : i32
    scf.if %2 {
      %cst_62 = arith.constant 0.000000e+00 : f32
      %70 = vector.broadcast %cst_62 : f32 to vector<2x8x128xf32>
      %c0_63 = arith.constant 0 : index
      %c0_64 = arith.constant 0 : index
      %c0_65 = arith.constant 0 : index
      %71 = vector.load %arg8[%c0_63, %c0_64, %c0_65] : memref<2x8x128xf32, #tpu.memory_space<vmem>>, vector<2x8x128xf32>
      tpu.vector_store %arg8[%c0_63, %c0_64, %c0_65], %70 {strides = array<i32>} : memref<2x8x128xf32, #tpu.memory_space<vmem>>, vector<2x8x128xf32>,
    } else {
    }
    %c0 = arith.constant 0 : index
    %c0_1 = arith.constant 0 : index
    %c0_2 = arith.constant 0 : index
    %c0_3 = arith.constant 0 : index
    %3 = vector.load %arg3[%c0, %c0_1, %c0_2, %c0_3] : memref<2x1x10x16xbf16, #tpu.memory_space<vmem>>, vector<1x1x8x16xbf16>
    %4 = vector.shape_cast %3 : vector<1x1x8x16xbf16> to vector<8x16xbf16>
    %c3_i32 = arith.constant 3 : i32
    %5 = arith.muli %arg2, %c3_i32 : i32
    %c0_i32_4 = arith.constant 0 : i32
    %6 = arith.addi %5, %c0_i32_4 : i32
    %7 = arith.index_cast %6 : i32 to index
    %c0_5 = arith.constant 0 : index
    %c0_6 = arith.constant 0 : index
    %8 = vector.load %arg4[%7, %c0_5, %c0_6] : memref<9x16x128xbf16, #tpu.memory_space<vmem>>, vector<1x16x128xbf16>
    %9 = vector.shape_cast %8 : vector<1x16x128xbf16> to vector<16x128xbf16>
    %cst = arith.constant dense<0.000000e+00> : vector<8x128xf32>
    %10 = tpu.matmul %4, %9, %cst {dimension_numbers = #tpu.dot_dimension_numbers<[1], [0], [0], [1], [0, 0, 1, 1], [], []>} : vector<8x16xbf16>, vector<16x128xbf16>, vector<8x128xf32> -> vector<8x128xf32>
    %c0_7 = arith.constant 0 : index
    %c0_8 = arith.constant 0 : index
    %c1 = arith.constant 1 : index
    %c0_9 = arith.constant 0 : index
    %11 = vector.load %arg3[%c0_7, %c0_8, %c1, %c0_9] : memref<2x1x10x16xbf16, #tpu.memory_space<vmem>>, vector<1x1x8x16xbf16>
    %12 = vector.shape_cast %11 : vector<1x1x8x16xbf16> to vector<8x16xbf16>
    %c3_i32_10 = arith.constant 3 : i32
    %13 = arith.muli %arg2, %c3_i32_10 : i32
    %c1_i32 = arith.constant 1 : i32
    %14 = arith.addi %13, %c1_i32 : i32
    %15 = arith.index_cast %14 : i32 to index
    %c0_11 = arith.constant 0 : index
    %c0_12 = arith.constant 0 : index
    %16 = vector.load %arg4[%15, %c0_11, %c0_12] : memref<9x16x128xbf16, #tpu.memory_space<vmem>>, vector<1x16x128xbf16>
    %17 = vector.shape_cast %16 : vector<1x16x128xbf16> to vector<16x128xbf16>
    %cst_13 = arith.constant dense<0.000000e+00> : vector<8x128xf32>
    %18 = tpu.matmul %12, %17, %cst_13 {dimension_numbers = #tpu.dot_dimension_numbers<[1], [0], [0], [1], [0, 0, 1, 1], [], []>} : vector<8x16xbf16>, vector<16x128xbf16>, vector<8x128xf32> -> vector<8x128xf32>
    %19 = arith.addf %10, %18 : vector<8x128xf32>
    %c0_14 = arith.constant 0 : index
    %c0_15 = arith.constant 0 : index
    %c2 = arith.constant 2 : index
    %c0_16 = arith.constant 0 : index
    %20 = vector.load %arg3[%c0_14, %c0_15, %c2, %c0_16] : memref<2x1x10x16xbf16, #tpu.memory_space<vmem>>, vector<1x1x8x16xbf16>
    %21 = vector.shape_cast %20 : vector<1x1x8x16xbf16> to vector<8x16xbf16>
    %c3_i32_17 = arith.constant 3 : i32
    %22 = arith.muli %arg2, %c3_i32_17 : i32
    %c2_i32 = arith.constant 2 : i32
    %23 = arith.addi %22, %c2_i32 : i32
    %24 = arith.index_cast %23 : i32 to index
    %c0_18 = arith.constant 0 : index
    %c0_19 = arith.constant 0 : index
    %25 = vector.load %arg4[%24, %c0_18, %c0_19] : memref<9x16x128xbf16, #tpu.memory_space<vmem>>, vector<1x16x128xbf16>
    %26 = vector.shape_cast %25 : vector<1x16x128xbf16> to vector<16x128xbf16>
    %cst_20 = arith.constant dense<0.000000e+00> : vector<8x128xf32>
    %27 = tpu.matmul %21, %26, %cst_20 {dimension_numbers = #tpu.dot_dimension_numbers<[1], [0], [0], [1], [0, 0, 1, 1], [], []>} : vector<8x16xbf16>, vector<16x128xbf16>, vector<8x128xf32> -> vector<8x128xf32>
    %28 = arith.addf %19, %27 : vector<8x128xf32>
    %c0_21 = arith.constant 0 : index
    %c0_22 = arith.constant 0 : index
    %c0_23 = arith.constant 0 : index
    %29 = vector.load %arg8[%c0_21, %c0_22, %c0_23] : memref<2x8x128xf32, #tpu.memory_space<vmem>>, vector<1x8x128xf32>
    %30 = vector.shape_cast %29 : vector<1x8x128xf32> to vector<8x128xf32>
    %31 = arith.addf %30, %28 : vector<8x128xf32>
    %c0_24 = arith.constant 0 : index
    %c0_25 = arith.constant 0 : index
    %c0_26 = arith.constant 0 : index
    %32 = vector.load %arg8[%c0_24, %c0_25, %c0_26] : memref<2x8x128xf32, #tpu.memory_space<vmem>>, vector<1x8x128xf32>
    %33 = vector.shape_cast %32 : vector<1x8x128xf32> to vector<8x128xf32>
    %34 = vector.shape_cast %31 : vector<8x128xf32> to vector<1x8x128xf32>
    tpu.vector_store %arg8[%c0_24, %c0_25, %c0_26], %34 {strides = array<i32>} : memref<2x8x128xf32, #tpu.memory_space<vmem>>, vector<1x8x128xf32>,
    %c1_27 = arith.constant 1 : index
    %c0_28 = arith.constant 0 : index
    %c0_29 = arith.constant 0 : index
    %c0_30 = arith.constant 0 : index
    %35 = vector.load %arg3[%c1_27, %c0_28, %c0_29, %c0_30] : memref<2x1x10x16xbf16, #tpu.memory_space<vmem>>, vector<1x1x8x16xbf16>
    %36 = vector.shape_cast %35 : vector<1x1x8x16xbf16> to vector<8x16xbf16>
    %c3_i32_31 = arith.constant 3 : i32
    %37 = arith.muli %arg2, %c3_i32_31 : i32
    %c0_i32_32 = arith.constant 0 : i32
    %38 = arith.addi %37, %c0_i32_32 : i32
    %39 = arith.index_cast %38 : i32 to index
    %c0_33 = arith.constant 0 : index
    %c0_34 = arith.constant 0 : index
    %40 = vector.load %arg4[%39, %c0_33, %c0_34] : memref<9x16x128xbf16, #tpu.memory_space<vmem>>, vector<1x16x128xbf16>
    %41 = vector.shape_cast %40 : vector<1x16x128xbf16> to vector<16x128xbf16>
    %cst_35 = arith.constant dense<0.000000e+00> : vector<8x128xf32>
    %42 = tpu.matmul %36, %41, %cst_35 {dimension_numbers = #tpu.dot_dimension_numbers<[1], [0], [0], [1], [0, 0, 1, 1], [], []>} : vector<8x16xbf16>, vector<16x128xbf16>, vector<8x128xf32> -> vector<8x128xf32>
    %c1_36 = arith.constant 1 : index
    %c0_37 = arith.constant 0 : index
    %c1_38 = arith.constant 1 : index
    %c0_39 = arith.constant 0 : index
    %43 = vector.load %arg3[%c1_36, %c0_37, %c1_38, %c0_39] : memref<2x1x10x16xbf16, #tpu.memory_space<vmem>>, vector<1x1x8x16xbf16>
    %44 = vector.shape_cast %43 : vector<1x1x8x16xbf16> to vector<8x16xbf16>
    %c3_i32_40 = arith.constant 3 : i32
    %45 = arith.muli %arg2, %c3_i32_40 : i32
    %c1_i32_41 = arith.constant 1 : i32
    %46 = arith.addi %45, %c1_i32_41 : i32
    %47 = arith.index_cast %46 : i32 to index
    %c0_42 = arith.constant 0 : index
    %c0_43 = arith.constant 0 : index
    %48 = vector.load %arg4[%47, %c0_42, %c0_43] : memref<9x16x128xbf16, #tpu.memory_space<vmem>>, vector<1x16x128xbf16>
    %49 = vector.shape_cast %48 : vector<1x16x128xbf16> to vector<16x128xbf16>
    %cst_44 = arith.constant dense<0.000000e+00> : vector<8x128xf32>
    %50 = tpu.matmul %44, %49, %cst_44 {dimension_numbers = #tpu.dot_dimension_numbers<[1], [0], [0], [1], [0, 0, 1, 1], [], []>} : vector<8x16xbf16>, vector<16x128xbf16>, vector<8x128xf32> -> vector<8x128xf32>
    %51 = arith.addf %42, %50 : vector<8x128xf32>
    %c1_45 = arith.constant 1 : index
    %c0_46 = arith.constant 0 : index
    %c2_47 = arith.constant 2 : index
    %c0_48 = arith.constant 0 : index
    %52 = vector.load %arg3[%c1_45, %c0_46, %c2_47, %c0_48] : memref<2x1x10x16xbf16, #tpu.memory_space<vmem>>, vector<1x1x8x16xbf16>
    %53 = vector.shape_cast %52 : vector<1x1x8x16xbf16> to vector<8x16xbf16>
    %c3_i32_49 = arith.constant 3 : i32
    %54 = arith.muli %arg2, %c3_i32_49 : i32
    %c2_i32_50 = arith.constant 2 : i32
    %55 = arith.addi %54, %c2_i32_50 : i32
    %56 = arith.index_cast %55 : i32 to index
    %c0_51 = arith.constant 0 : index
    %c0_52 = arith.constant 0 : index
    %57 = vector.load %arg4[%56, %c0_51, %c0_52] : memref<9x16x128xbf16, #tpu.memory_space<vmem>>, vector<1x16x128xbf16>
    %58 = vector.shape_cast %57 : vector<1x16x128xbf16> to vector<16x128xbf16>
    %cst_53 = arith.constant dense<0.000000e+00> : vector<8x128xf32>
    %59 = tpu.matmul %53, %58, %cst_53 {dimension_numbers = #tpu.dot_dimension_numbers<[1], [0], [0], [1], [0, 0, 1, 1], [], []>} : vector<8x16xbf16>, vector<16x128xbf16>, vector<8x128xf32> -> vector<8x128xf32>
    %60 = arith.addf %51, %59 : vector<8x128xf32>
    %c1_54 = arith.constant 1 : index
    %c0_55 = arith.constant 0 : index
    %c0_56 = arith.constant 0 : index
    %61 = vector.load %arg8[%c1_54, %c0_55, %c0_56] : memref<2x8x128xf32, #tpu.memory_space<vmem>>, vector<1x8x128xf32>
    %62 = vector.shape_cast %61 : vector<1x8x128xf32> to vector<8x128xf32>
    %63 = arith.addf %62, %60 : vector<8x128xf32>
    %c1_57 = arith.constant 1 : index
    %c0_58 = arith.constant 0 : index
    %c0_59 = arith.constant 0 : index
    %64 = vector.load %arg8[%c1_57, %c0_58, %c0_59] : memref<2x8x128xf32, #tpu.memory_space<vmem>>, vector<1x8x128xf32>
    %65 = vector.shape_cast %64 : vector<1x8x128xf32> to vector<8x128xf32>
    %66 = vector.shape_cast %63 : vector<8x128xf32> to vector<1x8x128xf32>
    tpu.vector_store %arg8[%c1_57, %c0_58, %c0_59], %66 {strides = array<i32>} : memref<2x8x128xf32, #tpu.memory_space<vmem>>, vector<1x8x128xf32>,
    %c2_i32_60 = arith.constant 2 : i32
    %67 = arith.cmpi eq, %arg2, %c2_i32_60 : i32
    %68 = arith.extui %67 : i1 to i32
    %c0_i32_61 = arith.constant 0 : i32
    %69 = arith.cmpi ne, %68, %c0_i32_61 : i32
    scf.if %69 {
      %c0_62 = arith.constant 0 : index
      %c0_63 = arith.constant 0 : index
      %c0_64 = arith.constant 0 : index
      %70 = vector.load %arg8[%c0_62, %c0_63, %c0_64] : memref<2x8x128xf32, #tpu.memory_space<vmem>>, vector<2x8x128xf32>
      %c0_65 = arith.constant 0 : index
      %c0_66 = arith.constant 0 : index
      %c0_67 = arith.constant 0 : index
      %71 = vector.load %arg5[%c0_65, %c0_66, %c0_67] : memref<1x1x128xf32, #tpu.memory_space<vmem>>, vector<1x1x128xf32>
      %72 = vector.broadcast %71 : vector<1x1x128xf32> to vector<2x8x128xf32>
      %73 = arith.addf %70, %72 : vector<2x8x128xf32>
      %cst_68 = arith.constant 0.000000e+00 : f32
      %74 = vector.broadcast %cst_68 : f32 to vector<2x8x128xf32>
      %75 = arith.cmpf oge, %73, %74 : vector<2x8x128xf32>
      %cst_69 = arith.constant 2.000000e-01 : f32
      %76 = vector.broadcast %cst_69 : f32 to vector<2x8x128xf32>
      %77 = arith.mulf %76, %73 : vector<2x8x128xf32>
      %78 = arith.select %75, %73, %77 : vector<2x8x128xi1>, vector<2x8x128xf32>
      %c0_70 = arith.constant 0 : index
      %c0_71 = arith.constant 0 : index
      %c0_72 = arith.constant 0 : index
      %c0_73 = arith.constant 0 : index
      %79 = vector.load %arg6[%c0_70, %c0_71, %c0_72, %c0_73] : memref<2x1x8x128xbf16, #tpu.memory_space<vmem>>, vector<2x1x8x128xbf16>
      %80 = vector.shape_cast %79 : vector<2x1x8x128xbf16> to vector<2x8x128xbf16>
      %81 = arith.extf %80 : vector<2x8x128xbf16> to vector<2x8x128xf32>
      %82 = arith.addf %78, %81 : vector<2x8x128xf32>
      %83 = vector.shape_cast %82 : vector<2x8x128xf32> to vector<2x1x8x128xf32>
      %84 = arith.truncf %83 : vector<2x1x8x128xf32> to vector<2x1x8x128xbf16>
      %c0_74 = arith.constant 0 : index
      %c0_75 = arith.constant 0 : index
      %c0_76 = arith.constant 0 : index
      %c0_77 = arith.constant 0 : index
      %85 = vector.load %arg7[%c0_74, %c0_75, %c0_76, %c0_77] : memref<2x1x8x128xbf16, #tpu.memory_space<vmem>>, vector<2x1x8x128xbf16>
      tpu.vector_store %arg7[%c0_74, %c0_75, %c0_76, %c0_77], %84 {strides = array<i32>} : memref<2x1x8x128xbf16, #tpu.memory_space<vmem>>, vector<2x1x8x128xbf16>,
    } else {
    }
    return
  }
  func.func @transform_0(%arg0: i32, %arg1: i32, %arg2: i32) -> (i32, i32, i32, i32) {
    %0 = arith.addi %arg1, %arg2 : i32
    %c0_i32 = arith.constant 0 : i32
    %c0_i32_0 = arith.constant 0 : i32
    %c0_i32_1 = arith.constant 0 : i32
    return %arg0, %0, %c0_i32, %c0_i32_0 : i32, i32, i32, i32
  }
  func.func @transform_1(%arg0: i32, %arg1: i32, %arg2: i32) -> (i32, i32, i32) {
    %c0_i32 = arith.constant 0 : i32
    %c0_i32_0 = arith.constant 0 : i32
    %c0_i32_1 = arith.constant 0 : i32
    %c0_i32_2 = arith.constant 0 : i32
    return %c0_i32, %c0_i32_0, %c0_i32_1 : i32, i32, i32
  }
  func.func @transform_2(%arg0: i32, %arg1: i32, %arg2: i32) -> (i32, i32, i32) {
    %c0_i32 = arith.constant 0 : i32
    %c0_i32_0 = arith.constant 0 : i32
    %c0_i32_1 = arith.constant 0 : i32
    %c0_i32_2 = arith.constant 0 : i32
    return %c0_i32, %c0_i32_0, %c0_i32_1 : i32, i32, i32
  }
  func.func @transform_3(%arg0: i32, %arg1: i32, %arg2: i32) -> (i32, i32, i32, i32) {
    %c0_i32 = arith.constant 0 : i32
    %c0_i32_0 = arith.constant 0 : i32
    %c0_i32_1 = arith.constant 0 : i32
    return %arg0, %arg1, %c0_i32, %c0_i32_0 : i32, i32, i32, i32
  }
  func.func @transform_4(%arg0: i32, %arg1: i32, %arg2: i32) -> (i32, i32, i32, i32) {
    %c0_i32 = arith.constant 0 : i32
    %c0_i32_0 = arith.constant 0 : i32
    %c0_i32_1 = arith.constant 0 : i32
    return %arg0, %arg1, %c0_i32, %c0_i32_0 : i32, i32, i32, i32
  }
}

module attributes {stable_mosaic.version = 11 : i64} {
  func.func @kernel(%arg0: i32, %arg1: i32, %arg2: i32, %arg3: memref<2x1x9x16xbf16, #tpu.memory_space<vmem>>, %arg4: memref<4x16x128xbf16, #tpu.memory_space<vmem>>, %arg5: memref<2x1x8x128xbf16, #tpu.memory_space<vmem>>, %arg6: memref<2x8x128xf32, #tpu.memory_space<vmem>>) attributes {dimension_semantics = [#tpu.dimension_semantics<parallel>, #tpu.dimension_semantics<parallel>, #tpu.dimension_semantics<arbitrary>], iteration_bounds = array<i64: 1, 8, 2>, scalar_prefetch = 0 : i64, scratch_operands = 1 : i64, tpu.core_type = #tpu.core_type<tc>, window_params = [{transform_indices = @transform_0, window_bounds = array<i64: 2, 1, 9, 16>}, {pipeline_mode = #tpu.pipeline_mode<synchronous>, transform_indices = @transform_1, window_bounds = array<i64: 4, 16, 128>}, {transform_indices = @transform_2, window_bounds = array<i64: 2, 1, 8, 128>}]} {
    %c0_i32 = arith.constant 0 : i32
    %0 = arith.cmpi eq, %arg2, %c0_i32 : i32
    %1 = arith.extui %0 : i1 to i32
    %c0_i32_0 = arith.constant 0 : i32
    %2 = arith.cmpi ne, %1, %c0_i32_0 : i32
    scf.if %2 {
      %cst_46 = arith.constant 0.000000e+00 : f32
      %52 = vector.broadcast %cst_46 : f32 to vector<2x8x128xf32>
      %c0_47 = arith.constant 0 : index
      %c0_48 = arith.constant 0 : index
      %c0_49 = arith.constant 0 : index
      %53 = vector.load %arg6[%c0_47, %c0_48, %c0_49] : memref<2x8x128xf32, #tpu.memory_space<vmem>>, vector<2x8x128xf32>
      tpu.vector_store %arg6[%c0_47, %c0_48, %c0_49], %52 {strides = array<i32>} : memref<2x8x128xf32, #tpu.memory_space<vmem>>, vector<2x8x128xf32>,
    } else {
    }
    %c0 = arith.constant 0 : index
    %c0_1 = arith.constant 0 : index
    %c0_2 = arith.constant 0 : index
    %c0_3 = arith.constant 0 : index
    %3 = vector.load %arg3[%c0, %c0_1, %c0_2, %c0_3] : memref<2x1x9x16xbf16, #tpu.memory_space<vmem>>, vector<1x1x8x16xbf16>
    %4 = vector.shape_cast %3 : vector<1x1x8x16xbf16> to vector<8x16xbf16>
    %c2_i32 = arith.constant 2 : i32
    %5 = arith.muli %arg2, %c2_i32 : i32
    %c0_i32_4 = arith.constant 0 : i32
    %6 = arith.addi %5, %c0_i32_4 : i32
    %7 = arith.index_cast %6 : i32 to index
    %c0_5 = arith.constant 0 : index
    %c0_6 = arith.constant 0 : index
    %8 = vector.load %arg4[%7, %c0_5, %c0_6] : memref<4x16x128xbf16, #tpu.memory_space<vmem>>, vector<1x16x128xbf16>
    %9 = vector.shape_cast %8 : vector<1x16x128xbf16> to vector<16x128xbf16>
    %cst = arith.constant dense<0.000000e+00> : vector<8x128xf32>
    %10 = tpu.matmul %4, %9, %cst {dimension_numbers = #tpu.dot_dimension_numbers<[1], [0], [0], [1], [0, 0, 1, 1], [], []>} : vector<8x16xbf16>, vector<16x128xbf16>, vector<8x128xf32> -> vector<8x128xf32>
    %c0_7 = arith.constant 0 : index
    %c0_8 = arith.constant 0 : index
    %c1 = arith.constant 1 : index
    %c0_9 = arith.constant 0 : index
    %11 = vector.load %arg3[%c0_7, %c0_8, %c1, %c0_9] : memref<2x1x9x16xbf16, #tpu.memory_space<vmem>>, vector<1x1x8x16xbf16>
    %12 = vector.shape_cast %11 : vector<1x1x8x16xbf16> to vector<8x16xbf16>
    %c2_i32_10 = arith.constant 2 : i32
    %13 = arith.muli %arg2, %c2_i32_10 : i32
    %c1_i32 = arith.constant 1 : i32
    %14 = arith.addi %13, %c1_i32 : i32
    %15 = arith.index_cast %14 : i32 to index
    %c0_11 = arith.constant 0 : index
    %c0_12 = arith.constant 0 : index
    %16 = vector.load %arg4[%15, %c0_11, %c0_12] : memref<4x16x128xbf16, #tpu.memory_space<vmem>>, vector<1x16x128xbf16>
    %17 = vector.shape_cast %16 : vector<1x16x128xbf16> to vector<16x128xbf16>
    %cst_13 = arith.constant dense<0.000000e+00> : vector<8x128xf32>
    %18 = tpu.matmul %12, %17, %cst_13 {dimension_numbers = #tpu.dot_dimension_numbers<[1], [0], [0], [1], [0, 0, 1, 1], [], []>} : vector<8x16xbf16>, vector<16x128xbf16>, vector<8x128xf32> -> vector<8x128xf32>
    %19 = arith.addf %10, %18 : vector<8x128xf32>
    %c0_14 = arith.constant 0 : index
    %c0_15 = arith.constant 0 : index
    %c0_16 = arith.constant 0 : index
    %20 = vector.load %arg6[%c0_14, %c0_15, %c0_16] : memref<2x8x128xf32, #tpu.memory_space<vmem>>, vector<1x8x128xf32>
    %21 = vector.shape_cast %20 : vector<1x8x128xf32> to vector<8x128xf32>
    %22 = arith.addf %21, %19 : vector<8x128xf32>
    %c0_17 = arith.constant 0 : index
    %c0_18 = arith.constant 0 : index
    %c0_19 = arith.constant 0 : index
    %23 = vector.load %arg6[%c0_17, %c0_18, %c0_19] : memref<2x8x128xf32, #tpu.memory_space<vmem>>, vector<1x8x128xf32>
    %24 = vector.shape_cast %23 : vector<1x8x128xf32> to vector<8x128xf32>
    %25 = vector.shape_cast %22 : vector<8x128xf32> to vector<1x8x128xf32>
    tpu.vector_store %arg6[%c0_17, %c0_18, %c0_19], %25 {strides = array<i32>} : memref<2x8x128xf32, #tpu.memory_space<vmem>>, vector<1x8x128xf32>,
    %c1_20 = arith.constant 1 : index
    %c0_21 = arith.constant 0 : index
    %c0_22 = arith.constant 0 : index
    %c0_23 = arith.constant 0 : index
    %26 = vector.load %arg3[%c1_20, %c0_21, %c0_22, %c0_23] : memref<2x1x9x16xbf16, #tpu.memory_space<vmem>>, vector<1x1x8x16xbf16>
    %27 = vector.shape_cast %26 : vector<1x1x8x16xbf16> to vector<8x16xbf16>
    %c2_i32_24 = arith.constant 2 : i32
    %28 = arith.muli %arg2, %c2_i32_24 : i32
    %c0_i32_25 = arith.constant 0 : i32
    %29 = arith.addi %28, %c0_i32_25 : i32
    %30 = arith.index_cast %29 : i32 to index
    %c0_26 = arith.constant 0 : index
    %c0_27 = arith.constant 0 : index
    %31 = vector.load %arg4[%30, %c0_26, %c0_27] : memref<4x16x128xbf16, #tpu.memory_space<vmem>>, vector<1x16x128xbf16>
    %32 = vector.shape_cast %31 : vector<1x16x128xbf16> to vector<16x128xbf16>
    %cst_28 = arith.constant dense<0.000000e+00> : vector<8x128xf32>
    %33 = tpu.matmul %27, %32, %cst_28 {dimension_numbers = #tpu.dot_dimension_numbers<[1], [0], [0], [1], [0, 0, 1, 1], [], []>} : vector<8x16xbf16>, vector<16x128xbf16>, vector<8x128xf32> -> vector<8x128xf32>
    %c1_29 = arith.constant 1 : index
    %c0_30 = arith.constant 0 : index
    %c1_31 = arith.constant 1 : index
    %c0_32 = arith.constant 0 : index
    %34 = vector.load %arg3[%c1_29, %c0_30, %c1_31, %c0_32] : memref<2x1x9x16xbf16, #tpu.memory_space<vmem>>, vector<1x1x8x16xbf16>
    %35 = vector.shape_cast %34 : vector<1x1x8x16xbf16> to vector<8x16xbf16>
    %c2_i32_33 = arith.constant 2 : i32
    %36 = arith.muli %arg2, %c2_i32_33 : i32
    %c1_i32_34 = arith.constant 1 : i32
    %37 = arith.addi %36, %c1_i32_34 : i32
    %38 = arith.index_cast %37 : i32 to index
    %c0_35 = arith.constant 0 : index
    %c0_36 = arith.constant 0 : index
    %39 = vector.load %arg4[%38, %c0_35, %c0_36] : memref<4x16x128xbf16, #tpu.memory_space<vmem>>, vector<1x16x128xbf16>
    %40 = vector.shape_cast %39 : vector<1x16x128xbf16> to vector<16x128xbf16>
    %cst_37 = arith.constant dense<0.000000e+00> : vector<8x128xf32>
    %41 = tpu.matmul %35, %40, %cst_37 {dimension_numbers = #tpu.dot_dimension_numbers<[1], [0], [0], [1], [0, 0, 1, 1], [], []>} : vector<8x16xbf16>, vector<16x128xbf16>, vector<8x128xf32> -> vector<8x128xf32>
    %42 = arith.addf %33, %41 : vector<8x128xf32>
    %c1_38 = arith.constant 1 : index
    %c0_39 = arith.constant 0 : index
    %c0_40 = arith.constant 0 : index
    %43 = vector.load %arg6[%c1_38, %c0_39, %c0_40] : memref<2x8x128xf32, #tpu.memory_space<vmem>>, vector<1x8x128xf32>
    %44 = vector.shape_cast %43 : vector<1x8x128xf32> to vector<8x128xf32>
    %45 = arith.addf %44, %42 : vector<8x128xf32>
    %c1_41 = arith.constant 1 : index
    %c0_42 = arith.constant 0 : index
    %c0_43 = arith.constant 0 : index
    %46 = vector.load %arg6[%c1_41, %c0_42, %c0_43] : memref<2x8x128xf32, #tpu.memory_space<vmem>>, vector<1x8x128xf32>
    %47 = vector.shape_cast %46 : vector<1x8x128xf32> to vector<8x128xf32>
    %48 = vector.shape_cast %45 : vector<8x128xf32> to vector<1x8x128xf32>
    tpu.vector_store %arg6[%c1_41, %c0_42, %c0_43], %48 {strides = array<i32>} : memref<2x8x128xf32, #tpu.memory_space<vmem>>, vector<1x8x128xf32>,
    %c1_i32_44 = arith.constant 1 : i32
    %49 = arith.cmpi eq, %arg2, %c1_i32_44 : i32
    %50 = arith.extui %49 : i1 to i32
    %c0_i32_45 = arith.constant 0 : i32
    %51 = arith.cmpi ne, %50, %c0_i32_45 : i32
    scf.if %51 {
      %c0_46 = arith.constant 0 : index
      %c0_47 = arith.constant 0 : index
      %c0_48 = arith.constant 0 : index
      %52 = vector.load %arg6[%c0_46, %c0_47, %c0_48] : memref<2x8x128xf32, #tpu.memory_space<vmem>>, vector<2x8x128xf32>
      %53 = vector.shape_cast %52 : vector<2x8x128xf32> to vector<2x1x8x128xf32>
      %54 = arith.truncf %53 : vector<2x1x8x128xf32> to vector<2x1x8x128xbf16>
      %c0_49 = arith.constant 0 : index
      %c0_50 = arith.constant 0 : index
      %c0_51 = arith.constant 0 : index
      %c0_52 = arith.constant 0 : index
      %55 = vector.load %arg5[%c0_49, %c0_50, %c0_51, %c0_52] : memref<2x1x8x128xbf16, #tpu.memory_space<vmem>>, vector<2x1x8x128xbf16>
      tpu.vector_store %arg5[%c0_49, %c0_50, %c0_51, %c0_52], %54 {strides = array<i32>} : memref<2x1x8x128xbf16, #tpu.memory_space<vmem>>, vector<2x1x8x128xbf16>,
    } else {
    }
    return
  }
  func.func @transform_0(%arg0: i32, %arg1: i32, %arg2: i32) -> (i32, i32, i32, i32) {
    %0 = arith.addi %arg1, %arg2 : i32
    %c0_i32 = arith.constant 0 : i32
    %c0_i32_0 = arith.constant 0 : i32
    %c0_i32_1 = arith.constant 0 : i32
    return %arg0, %0, %c0_i32, %c0_i32_0 : i32, i32, i32, i32
  }
  func.func @transform_1(%arg0: i32, %arg1: i32, %arg2: i32) -> (i32, i32, i32) {
    %c0_i32 = arith.constant 0 : i32
    %c0_i32_0 = arith.constant 0 : i32
    %c0_i32_1 = arith.constant 0 : i32
    %c0_i32_2 = arith.constant 0 : i32
    return %c0_i32, %c0_i32_0, %c0_i32_1 : i32, i32, i32
  }
  func.func @transform_2(%arg0: i32, %arg1: i32, %arg2: i32) -> (i32, i32, i32, i32) {
    %c0_i32 = arith.constant 0 : i32
    %c0_i32_0 = arith.constant 0 : i32
    %c0_i32_1 = arith.constant 0 : i32
    return %arg0, %arg1, %c0_i32, %c0_i32_0 : i32, i32, i32, i32
  }
}

</mosaic_0001>

<bundles_post_ra>
// kernel: resblock_forward.3
= control target key start
LH: loop header
LB: loop body
LE: loop exit
PB: predicated region body
PF: predicated region fallthrough
CT: control target
= control target key end

     0   :  { %s1134_s12 = smov 0   ;;  %s1136_s13 = smov 0   ;;  %s1323_s0 = inlined_call_operand.vmem [shape: bf16[2,18,18,4], index: 0, kind: input, shape index: {}]   ;;  %s1324_s1 = inlined_call_operand.vmem [shape: bf16[9,4,128], index: 1, kind: input, shape index: {}]   ;;  %s1325_s2 = inlined_call_operand.vmem [shape: f32[1,1,128], index: 2, kind: input, shape index: {}]   ;;  %s1326_s3 = inlined_call_operand.vmem [shape: bf16[2,16,16,128], index: 3, kind: output, shape index: {}]  }
   0x1   :  { %s1138_s14 = smov 0   ;;  %s1140_s15 = smov 0  }
   0x2   :  { %s1142_s16 = smov 0   ;;  %s1144_s17 = smov 0  }
   0x3   :  { %s1146_s18 = smov 0   ;;  %s1148_s19 = smov 0  }
   0x4   :  { %s1150_s20 = smov 0  }
   0x5 LB: > { %s25_s21 = sadd.s32 1, %s1101_s18  ;;  %s28_s22 = sadd.s32 1, %s1105_s19  ;;  %s1109_s20 = sphi %s1150_s20, %s13_s20   ;;  %s1105_s19 = sphi %s1148_s19, %s1336_s19   ;;  %s1101_s18 = sphi %s1146_s18, %s1335_s18   ;;  %s1097_s17 = sphi %s1144_s17, %s1334_s17   ;;  %s1093_s16 = sphi %s1142_s16, %s1333_s16   ;;  %s1089_s15 = sphi %s1140_s15, %s1332_s15   ;;  %s1085_s14 = sphi %s1138_s14, %s1331_s14   ;;  %s1081_s13 = sphi %s1136_s13, %s1330_s13   ;;  %s1077_s12 = sphi %s1134_s12, %s1329_s12  }
   0x6   : > { %p26_p0 = scmp.ge.s32.totalorder %s25_s21, 3  ;;  %s848_s23 = sadd.s32 4294967295, %s1109_s20  }
   0x7   : > { %s36_s24 = sadd.s32 %s1101_s18, %s1105_s19  ;;  %p50_p1 = scmp.ne.s32.totalorder %s1089_s15, %s1085_s14 }
   0x8   : > { %s1338_s21 = smov (%p26_p0, %s25_s21), 0  ;;  %s1340_s22 = smov (!%p26_p0, %s28_s22), %s1105_s19 }
   0x9   : > { %p51_p2 = scmp.eq.s32.totalorder %s1109_s20, 0  ;;  %p30_p3 = scmp.ge.s32.totalorder %s1340_s22, 16 }
   0xa   : > { %s43_s25 = sadd.s32 1, %s1089_s15  ;;  %p123_p5 = scmp.ne.s32.totalorder %s1081_s13, %s1077_s12 }
   0xb   : > { %p1191_p4 = por %p51_p2, %p50_p1  ;;  %s1342_s22 = smov (%p30_p3, %s1340_s22), 0 }
   0xc   : > { %s113_s27 = sadd.s32 1, %s1081_s13  ;;  %p124_p6 = scmp.eq.s32.totalorder %s848_s23, 47 }
   0xd   : > { %s37_s28 = sadd.s32 %s1342_s22, %s1338_s21  ;;  %s109_s29 = ssub.s32 %s1105_s19, %s1342_s22 }
   0xe   : > { %s39_s30 = ssub.s32 %s36_s24, %s37_s28  ;;  %p111_p7 = scmp.eq.s32.totalorder %s109_s29, 0 }
   0xf   : > { %p41_p8 = scmp.eq.s32.totalorder %s39_s30, 0  ;;  %p1204_p9 = por %p124_p6, %p123_p5 }
  0x10   : > { %s1209_s5 = scalar_select %p111_p7, %s1081_s13, %s113_s27  }
  0x11   : > { %s1212_s6 = scalar_select %p41_p8, %s1089_s15, %s43_s25  }
  0x12   : > { %p851_p10 = scmp.ge.s32.totalorder %s1109_s20, 48 }
  0x14   : > { %152 = sbr.rel (%p851_p10) target bundleno = 34 (0x22), region = 24 }
  0x1b   : > { %155 = sbr.rel (!%p1191_p4) target bundleno = 34 (0x22), region = 28  ;;  %s157_s7 = sand.u32 (%p1191_p4), 1, %s1089_s15  }
  0x1c   : > { %s956_s8 = smul.u32 (%p1191_p4), 12, %s36_s24 }
  0x1d   : > { %s955_s9 = smul.u32 (%p1191_p4), 24, %s157_s7 }
  0x1e   : > { %s166_s23 = scalar_lea.vmem (%p1191_p4), %s1323_s0, %s956_s8 }
  0x1f   : > { %v182_v0 = vld [vmem:[%s166_s23] sm:$0xff] (%p1191_p4)   ;;  %v186_v1 = vld [vmem:[%s166_s23 + $0x8] sm:$0xf] (%p1191_p4)  ;;  %v188_v2 = vld [vmem:[%s166_s23 + $0xd8] sm:$0xff] (%p1191_p4)   ;;  %s159_s27 = scalar_lea.vmem (%p1191_p4), [#allocation3], %s955_s9 }
  0x20   : > { %183 = vst [vmem:[%s159_s27] sm:$0xff] (%p1191_p4), %v182_v0   ;;  %187 = vst [vmem:[%s159_s27 + $0x8] sm:$0xf] (%p1191_p4), %v186_v1  ;;  %v192_v3 = vld [vmem:[%s166_s23 + $0xe0] sm:$0xf] (%p1191_p4) }
  0x21   : > { %189 = vst [vmem:[%s159_s27 + $0xc] sm:$0xff] (%p1191_p4), %v188_v2   ;;  %193 = vst [vmem:[%s159_s27 + $0x14] sm:$0xf] (%p1191_p4), %v192_v3 }
  0x22 PF: > { %p853_p11 = scmp.ge.s32.totalorder %s1109_s20, 1  ;;  %p227_p12 = scmp.lt.s32.totalorder %s1109_s20, 49 }
  0x24   : > { %p228_p13 = pnand %p853_p11, %p227_p12 }
  0x25   : > { %s234_s24 = sand.u32 (!%p228_p13), 1, %s1085_s14   ;;  %s253_s25 = sand.u32 (!%p228_p13), 1, %s1077_s12  }
  0x26   : > { %231 = sbr.rel (%p228_p13) target bundleno = 323 (0x143), region = 69  ;;  %s854_s28 = sshll.u32 (!%p228_p13), %s253_s25, 4 }
  0x27   : > { %s957_s26 = smul.u32 (!%p228_p13), 24, %s234_s24  ;;  %s1227_s30 = scalar_lea.vmem (!%p228_p13), [#allocation4], %s854_s28 }
  0x28   : > { %p855_p0 = scmp.ne.s32.totalorder (!%p228_p13), %s1093_s16, 0 }
  0x29   : > { %s1225_s29 = scalar_lea.vmem (!%p228_p13), [#allocation3], %s957_s26 }
  0x2d   : > { %263 = sbr.rel (%p855_p0) target bundleno = 52 (0x34), region = 77  ;;  %v1111_v4 = vmov (!%p855_p0), 0.0  }
  0x2e   : > { %264 = vst [vmem:[#allocation2] sm:$0xff] (!%p855_p0), %v1111_v4  ;;  %265 = vst [vmem:[#allocation2 + $0x8] sm:$0xff] (!%p855_p0), %v1111_v4 }
  0x2f   : > { %266 = vst [vmem:[#allocation2 + $0x10] sm:$0xff] (!%p855_p0), %v1111_v4  ;;  %267 = vst [vmem:[#allocation2 + $0x18] sm:$0xff] (!%p855_p0), %v1111_v4 }
  0x34 PF: > { %s890_s12 = smul.u32 6, %s1093_s16  ;;  %v268_v5 = vld [vmem:[%s1225_s29] sm:$0xf]  ;;  %v1112_v6 = vmov 0.0   ;;  %vm304_vm0 = vcmask 1041408   ;;  %vm1113_vm1 = vmmov 0  }
  0x35   : > { %919 = vmatprep.subr.bf16.mxu0 %v1112_v6  ;;  %925 = vmatprep.subr.bf16.mxu1 %v1112_v6  ;;  %v269_v7 = vld [vmem:[%s1225_s29 + $0x4] sm:$0xf]  ;;  %v1035_v9 = vld [vmem:[%s1225_s29 + $0x8] ss:$0 sps:$4 sm:$0x11]   ;;  %vm300_vm2 = vcmask 31744  }
  0x36   : > { %s1238_s8 = scalar_lea.vmem %s1324_s1, %s890_s12  ;;  %927 = vmatprep.mubr.msk.bf16.mxu1 %vm1113_vm1, %v1112_v6  ;;  %921 = vmatprep.mubr.msk.bf16.mxu0 %vm1113_vm1, %v1112_v6  ;;  %v859_v8 = vcombine.low %v268_v5, %v269_v7  ;;  %v395_v14 = vld [vmem:[%s1225_s29] sm:$0xe]  ;;  %v296_v17 = vshll.u32 %v1035_v9, 16  ;;  %v867_v20 = vld [vmem:[%s1225_s29 + $0xc] sm:$0xf]  ;;  %v405_v40 = vrot.slane %v1035_v9, 1 }
  0x37   : > { %v858_v10 = vld [vmem:[%s1238_s8 + $0x2] sm:$0x3]  ;;  %v273_v11 = vld [vmem:[%s1238_s8] sm:$0x3]  ;;  %v868_v21 = vld [vmem:[%s1225_s29 + $0x10] sm:$0xf]  ;;  %v865_v27 = vcombine.low %v395_v14, %v269_v7 }
  0x38   : > { %v306_v12 = vsel %vm304_vm0, %v858_v10, 0  ;;  %v352_v13 = vsel %vm304_vm0, %v273_v11, 0  ;;  %v289_v15 = vshrl.u32 %v859_v8, 16  ;;  %v291_v16 = vshll.u32 %v859_v8, 16  ;;  %v870_v18 = vld [vmem:[%s1238_s8 + $0x2] sm:$0x3] }
  0x39   : > { %920 = vmatpush3.bf16.msra.mxu0 %v306_v12  ;;  %926 = vmatpush3.bf16.msra.mxu1 %v352_v13  ;;  %v492_v19 = vsel %vm304_vm0, %v870_v18, 0  ;;  %v298_v23 = vrot.slane %v296_v17, 1  ;;  %v864_v24 = vld [vmem:[%s1238_s8 + $0x4] sm:$0x3]  ;;  %v871_v25 = vcombine.low %v867_v20, %v868_v21  ;;  %vm287_vm3 = vsmask.f32 7424 }
  0x3a   : > { %931 = vmatprep.subr.bf16.mxu0 %v1112_v6  ;;  %937 = vmatprep.subr.bf16.mxu1 %v1112_v6  ;;  %v293_v22 = vrot.slane %v291_v16, 1  ;;  %v1037_v26 = vld [vmem:[%s1225_s29 + $0x14] ss:$0 sps:$4 sm:$0x11]   ;;  %v411_v31 = vsel %vm304_vm0, %v864_v24, 0  ;;  %v404_v38 = vrot.slane %v865_v27, 1 }
  0x3b   : > { %v477_v29 = vshrl.u32 %v871_v25, 16  ;;  %v479_v30 = vshll.u32 %v871_v25, 16  ;;  %v484_v32 = vshll.u32 %v1037_v26, 16  ;;  %v875_v33 = vld [vmem:[%s1225_s29 + $0xc] sm:$0xe]  ;;  %vm403_vm4 = vcmask 1046528  }
  0x3c   : > { %928 = vmatmul.mubr.msk.bf16.vlgmr.msra.gmra.mrb[0].mxu1 %vm300_vm2, %v859_v8  ;;  %v294_v28 = vor.u32 %v293_v22, %v289_v15  ;;  %v876_v36 = vld [vmem:[%s1238_s8 + $0x4] sm:$0x3]  ;;  %v877_v41 = vcombine.low %v875_v33, %v868_v21  ;;  %v465_v44 = vld [vmem:[%s1238_s8] sm:$0x3]  ;;  %v406_v45 = vsel %vm403_vm4, %v404_v38, %v405_v40  ;;  %v587_v47 = vrot.slane %v1037_v26, 1  ;;  %v457_v5 = vld [vmem:[#allocation2 + $0x8] sm:$0xff] }
  0x3d   : > { %938 = vmatpush3.bf16.msra.mxu1 %v492_v19  ;;  %939 = vmatprep.mubr.msk.bf16.mxu1 %vm1113_vm1, %v1112_v6  ;;  %v481_v35 = vrot.slane %v479_v30, 1  ;;  %v486_v37 = vrot.slane %v484_v32, 1  ;;  %v593_v42 = vsel %vm304_vm0, %v876_v36, 0  ;;  %v538_v48 = vsel %vm304_vm0, %v465_v44, 0  ;;  %v456_v1 = vld [vmem:[#allocation2] sm:$0xff]  ;;  %v639_v17 = vld [vmem:[#allocation2 + $0x10] sm:$0xff] }
  0x3e   : > { %949 = vmatprep.subr.bf16.mxu1 %v1112_v6  ;;  %v299_v34 = vsel %vm287_vm3, %v294_v28, %v298_v23  ;;  %v586_v46 = vrot.slane %v877_v41, 1  ;;  %v640_v22 = vld [vmem:[#allocation2 + $0x18] sm:$0xff]  ;;  %p879_p1 = scmp.ne.s32.totalorder %s1093_s16, 2 }
  0x3f   : > { %922 = vmatmul.mubr.msk.bf16.vlgmr.msra.gmra.mrb[0].mxu0 %vm300_vm2, %v299_v34  ;;  %v482_v39 = vor.u32 %v481_v35, %v477_v29  ;;  %v880_v28 = vld [vmem:[%s1325_s2] ss:$0 sm:$0xff] (!%p879_p1) }
  0x40   : > { %932 = vmatpush3.bf16.msra.mxu0 %v411_v31  ;;  %933 = vmatprep.mubr.msk.bf16.mxu0 %vm1113_vm1, %v1112_v6  ;;  %v588_v49 = vsel %vm403_vm4, %v586_v46, %v587_v47 }
  0x41   : > { %943 = vmatprep.subr.bf16.mxu0 %v1112_v6  ;;  %v487_v43 = vsel %vm287_vm3, %v482_v39, %v486_v37 }
  0x44   : > { %940 = vmatmul.mubr.msk.bf16.vlgmr.msra.gmra.mrb[4].mxu1 %vm300_vm2, %v487_v43 }
  0x45   : > { %950 = vmatpush3.bf16.msra.mxu1 %v593_v42  ;;  %951 = vmatprep.mubr.msk.bf16.mxu1 %vm1113_vm1, %v1112_v6 }
  0x47   : > { %934 = vmatmul.mubr.msk.bf16.vlgmr.msra.gmra.mrb[4].mxu0 %vm300_vm2, %v406_v45 }
  0x48   : > { %944 = vmatpush3.bf16.msra.mxu0 %v538_v48  ;;  %945 = vmatprep.mubr.msk.bf16.mxu0 %vm1113_vm1, %v1112_v6 }
  0x4c   : > { %952 = vmatmul.mubr.msk.bf16.vlgmr.msra.gmra.mrb[8].mxu1 %vm300_vm2, %v588_v49 }
  0x4f   : > { %946 = vmatmul.mubr.msk.bf16.vlgmr.msra.gmra.mrb[8].mxu0 %vm300_vm2, %v871_v25 }
 0x10f   : > { %v388_v50 = vpop.f32.mrb[0].mxu1 }
 0x110   : > { %v929_v51 = vpop.f32.mrb[1].mxu1 }
 0x111   : > { %v391_v52 = vpop.f32.mrb[2].mxu1 }
 0x112   : > { %v930_v53 = vpop.f32.mrb[3].mxu1  ;;  %v342_v54 = vpop.f32.mrb[0].mxu0 }
 0x113   : > { %v389_v55 = vadd.f32 %v388_v50, %v342_v54  ;;  %v923_v56 = vpop.f32.mrb[1].mxu0 }
 0x114   : > { %v345_v57 = vpop.f32.mrb[2].mxu0 }
 0x115   : > { %v392_v58 = vadd.f32 %v391_v52, %v345_v57  ;;  %v924_v59 = vpop.f32.mrb[3].mxu0 }
 0x117   : > { %v528_v60 = vpop.f32.mrb[4].mxu1 }
 0x118   : > { %v941_v61 = vpop.f32.mrb[5].mxu1 }
 0x119   : > { %v531_v62 = vpop.f32.mrb[6].mxu1 }
 0x11a   : > { %v942_v63 = vpop.f32.mrb[7].mxu1  ;;  %v447_v0 = vpop.f32.mrb[4].mxu0 }
 0x11b   : > { %v454_v2 = vadd.f32 %v447_v0, %v389_v55  ;;  %v935_v3 = vpop.f32.mrb[5].mxu0 }
 0x11c   : > { %v450_v4 = vpop.f32.mrb[6].mxu0 }
 0x11d   : > { %v458_v6 = vadd.f32 %v456_v1, %v454_v2  ;;  %v455_v7 = vadd.f32 %v450_v4, %v392_v58  ;;  %v936_v8 = vpop.f32.mrb[7].mxu0 }
 0x11f   : > { %v629_v9 = vpop.f32.mrb[8].mxu1  ;;  %460 = vst [vmem:[#allocation2] sm:$0xff] %v458_v6  ;;  %v459_v10 = vadd.f32 %v457_v5, %v455_v7 }
 0x120   : > { %v953_v11 = vpop.f32.mrb[9].mxu1 }
 0x121   : > { %v632_v12 = vpop.f32.mrb[10].mxu1  ;;  %461 = vst [vmem:[#allocation2 + $0x8] sm:$0xff] %v459_v10 }
 0x122   : > { %v954_v13 = vpop.f32.mrb[11].mxu1  ;;  %v574_v14 = vpop.f32.mrb[8].mxu0 }
 0x123   : > { %v575_v15 = vadd.f32 %v574_v14, %v528_v60  ;;  %v947_v16 = vpop.f32.mrb[9].mxu0 }
 0x124   : > { %v577_v18 = vpop.f32.mrb[10].mxu0 }
 0x125   : > { %v636_v19 = vadd.f32 %v629_v9, %v575_v15  ;;  %v578_v20 = vadd.f32 %v577_v18, %v531_v62  ;;  %v948_v21 = vpop.f32.mrb[11].mxu0  ;;  %648 = sbr.rel (%p879_p1) target bundleno = 315 (0x13b), region = 81 }
 0x126   : > { %v649_v26 = vld [vmem:[#allocation2] sm:$0xff] (!%p879_p1) }
 0x127   : > { %v641_v23 = vadd.f32 %v639_v17, %v636_v19  ;;  %v637_v24 = vadd.f32 %v632_v12, %v578_v20  ;;  %v660_v29 = vadd.f32 (!%p879_p1), %v880_v28, %v649_v26 }
 0x128   : > { %v650_v27 = vld [vmem:[#allocation2 + $0x8] sm:$0xff] (!%p879_p1) }
 0x129   : > { %643 = vst [vmem:[#allocation2 + $0x10] sm:$0xff] %v641_v23  ;;  %v642_v25 = vadd.f32 %v640_v22, %v637_v24  ;;  %v661_v30 = vadd.f32 (!%p879_p1), %v880_v28, %v650_v27  ;;  %vm664_vm5 = vcmp.ge.f32.partialorder (!%p879_p1), %v660_v29, 0.0  ;;  %v668_v35 = vmul.f32 (!%p879_p1), 0.2, %v660_v29 }
 0x12b   : > { %644 = vst [vmem:[#allocation2 + $0x18] sm:$0xff] %v642_v25  ;;  %vm665_vm6 = vcmp.ge.f32.partialorder (!%p879_p1), %v661_v30, 0.0  ;;  %v669_v36 = vmul.f32 (!%p879_p1), 0.2, %v661_v30  ;;  %v672_v39 = vsel (!%p879_p1), %vm664_vm5, %v660_v29, %v668_v35 }
 0x12d   : > { %v673_v40 = vsel %vm665_vm6, %v661_v30, %v669_v36 }
 0x12e   : > { %v899_v41 = vpack.c.bf16 %v673_v40, %v672_v39 }
 0x130   : > { %v651_v31 = vld [vmem:[#allocation2 + $0x10] sm:$0xff]  ;;  %900 = vst [vmem:[%s1227_s30] sm:$0xff] %v899_v41  }
 0x131   : > { %v662_v33 = vadd.f32 %v880_v28, %v651_v31 }
 0x132   : > { %v652_v32 = vld [vmem:[#allocation2 + $0x18] sm:$0xff] }
 0x133   : > { %v663_v34 = vadd.f32 %v880_v28, %v652_v32  ;;  %vm666_vm7 = vcmp.ge.f32.partialorder %v662_v33, 0.0  ;;  %v670_v37 = vmul.f32 0.2, %v662_v33 }
 0x135   : > { %vm667_vm8 = vcmp.ge.f32.partialorder %v663_v34, 0.0  ;;  %v671_v38 = vmul.f32 0.2, %v663_v34  ;;  %v674_v42 = vsel %vm666_vm7, %v662_v33, %v670_v37 }
 0x137   : > { %v675_v43 = vsel %vm667_vm8, %v663_v34, %v671_v38 }
 0x138   : > { %v904_v44 = vpack.c.bf16 %v675_v43, %v674_v42 }
 0x13a   : > { %906 = vst [vmem:[%s1227_s30 + $0x8] sm:$0xff] %v904_v44  }
 0x13b PF: > { %702 = sbr.rel (!%p1204_p9) target bundleno = 323 (0x143), region = 85  ;;  %s895_s16 = sshll.u32 (%p1204_p9), %s1097_s17, 3  ;;  %v724_v45 = vld [vmem:[%s1227_s30] sm:$0xff] (%p1204_p9)  }
 0x13c   : > { %s708_s27 = scalar_lea.vmem (%p1204_p9), %s1326_s3, %s895_s16 }
 0x13d   : > { %725 = vst [vmem:[%s708_s27] sm:$0xff] (%p1204_p9), %v724_v45  }
 0x141   : > { %v728_v46 = vld [vmem:[%s1227_s30 + $0x8] sm:$0xff] (%p1204_p9)  }
 0x142   : > { %729 = vst [vmem:[%s708_s27 + $0x80] sm:$0xff] %v728_v46  }
 0x143 PF: > { %s13_s20 = sadd.s32 1, %s1109_s20   ;;  %s1329_s12 = smov %s1081_s13 }
 0x144   : > { %p10_p2 = scmp.ge.s32.totalorder %s13_s20, 50   ;;  %s1330_s13 = smov %s1209_s5 }
 0x145   : > { %s1331_s14 = smov %s1089_s15  ;;  %s1332_s15 = smov %s1212_s6 }
 0x146   : > { %s1333_s16 = smov %s1101_s18  ;;  %s1334_s17 = smov %s1105_s19 }
 0x147   : > { %s1335_s18 = smov %s1338_s21  ;;  %s1336_s19 = smov %s1342_s22 }
 0x148   :  { %12 = sbr.rel (!%p10_p2) target bundleno = 5 (0x5), region = 162 }

// kernel: resblock_forward.4
= control target key start
LH: loop header
LB: loop body
LE: loop exit
PB: predicated region body
PF: predicated region fallthrough
CT: control target
= control target key end

     0   :  { %s877_s9 = smov 0   ;;  %s879_s10 = smov 0   ;;  %s1020_s0 = inlined_call_operand.vmem [shape: bf16[2,9,9,16], index: 0, kind: input, shape index: {}]   ;;  %s1021_s1 = inlined_call_operand.vmem [shape: bf16[4,16,128], index: 1, kind: input, shape index: {}]   ;;  %s1022_s2 = inlined_call_operand.vmem [shape: bf16[2,8,8,128], index: 2, kind: output, shape index: {}]  }
   0x1   :  { %s881_s11 = smov 0   ;;  %s883_s12 = smov 0  }
   0x2   :  { %s885_s13 = smov 0   ;;  %s887_s14 = smov 0  }
   0x3   :  { %s889_s15 = smov 0   ;;  %s891_s16 = smov 0  }
   0x4   :  { %s893_s17 = smov 0  }
   0x5 LB: > { %s24_s18 = sadd.s32 1, %s849_s15  ;;  %s27_s19 = sadd.s32 1, %s853_s16  ;;  %s857_s17 = sphi %s893_s17, %s12_s17   ;;  %s853_s16 = sphi %s891_s16, %s1032_s16   ;;  %s849_s15 = sphi %s889_s15, %s1031_s15   ;;  %s845_s14 = sphi %s887_s14, %s1030_s14   ;;  %s841_s13 = sphi %s885_s13, %s1029_s13   ;;  %s837_s12 = sphi %s883_s12, %s1028_s12   ;;  %s833_s11 = sphi %s881_s11, %s1027_s11   ;;  %s829_s10 = sphi %s879_s10, %s1026_s10   ;;  %s825_s9 = sphi %s877_s9, %s1025_s9  }
   0x6   : > { %p25_p0 = scmp.ge.s32.totalorder %s24_s18, 2  ;;  %s628_s20 = sadd.s32 4294967295, %s857_s17  }
   0x7   : > { %s35_s21 = sadd.s32 %s849_s15, %s853_s16  ;;  %p49_p1 = scmp.ne.s32.totalorder %s837_s12, %s833_s11 }
   0x8   : > { %s1034_s18 = smov (%p25_p0, %s24_s18), 0  ;;  %s1036_s19 = smov (!%p25_p0, %s27_s19), %s853_s16 }
   0x9   : > { %p50_p2 = scmp.eq.s32.totalorder %s857_s17, 0  ;;  %p29_p3 = scmp.ge.s32.totalorder %s1036_s19, 8 }
   0xa   : > { %s42_s22 = sadd.s32 1, %s837_s12  ;;  %p101_p5 = scmp.ne.s32.totalorder %s829_s10, %s825_s9 }
   0xb   : > { %p934_p4 = por %p50_p2, %p49_p1  ;;  %s1038_s19 = smov (%p29_p3, %s1036_s19), 0 }
   0xc   : > { %s91_s24 = sadd.s32 1, %s829_s10  ;;  %p102_p6 = scmp.eq.s32.totalorder %s628_s20, 15 }
   0xd   : > { %s36_s25 = sadd.s32 %s1038_s19, %s1034_s18  ;;  %s87_s26 = ssub.s32 %s853_s16, %s1038_s19 }
   0xe   : > { %s38_s27 = ssub.s32 %s35_s21, %s36_s25  ;;  %p89_p7 = scmp.eq.s32.totalorder %s87_s26, 0 }
   0xf   : > { %p40_p8 = scmp.eq.s32.totalorder %s38_s27, 0  ;;  %p947_p9 = por %p102_p6, %p101_p5 }
  0x10   : > { %s952_s29 = scalar_select %p89_p7, %s829_s10, %s91_s24  }
  0x11   : > { %s955_s30 = scalar_select %p40_p8, %s837_s12, %s42_s22  }
  0x12   : > { %p631_p10 = scmp.ge.s32.totalorder %s857_s17, 16 }
  0x14   : > { %127 = sbr.rel (%p631_p10) target bundleno = 34 (0x22), region = 20 }
  0x1b   : > { %130 = sbr.rel (!%p934_p4) target bundleno = 34 (0x22), region = 24  ;;  %s132_s3 = sand.u32 (%p934_p4), 1, %s837_s12  }
  0x1c   : > { %s665_s4 = sshll.u32 (%p934_p4), %s35_s21, 3  ;;  %s632_s5 = sshll.u32 (%p934_p4), %s132_s3, 4 }
  0x1d   : > { %s141_s8 = scalar_lea.vmem (%p934_p4), %s1020_s0, %s665_s4  ;;  %s134_s20 = scalar_lea.vmem (%p934_p4), [#allocation3], %s632_s5 }
  0x1e   : > { %v157_v0 = vld [vmem:[%s141_s8] sm:$0xff] (%p934_p4)   ;;  %v161_v1 = vld [vmem:[%s141_s8 + $0x48] sm:$0xff] (%p934_p4)  }
  0x1f   : > { %158 = vst [vmem:[%s134_s20] sm:$0xff] (%p934_p4), %v157_v0   ;;  %162 = vst [vmem:[%s134_s20 + $0x8] sm:$0xff] (%p934_p4), %v161_v1  }
  0x22 PF: > { %p635_p11 = scmp.ge.s32.totalorder %s857_s17, 1  ;;  %p194_p12 = scmp.lt.s32.totalorder %s857_s17, 17 }
  0x24   : > { %p195_p13 = pnand %p635_p11, %p194_p12 }
  0x25   : > { %s201_s21 = sand.u32 (!%p195_p13), 1, %s833_s11   ;;  %s218_s22 = sand.u32 (!%p195_p13), 1, %s825_s9  }
  0x26   : > { %198 = sbr.rel (%p195_p13) target bundleno = 304 (0x130), region = 65  ;;  %s636_s23 = sshll.u32 (!%p195_p13), %s201_s21, 4 }
  0x27   : > { %s637_s24 = sshll.u32 (!%p195_p13), %s218_s22, 3  ;;  %s203_s25 = scalar_lea.vmem (!%p195_p13), [#allocation3], %s636_s23 }
  0x28   : > { %s968_s26 = scalar_lea.vmem (!%p195_p13), [#allocation4], %s637_s24  ;;  %p638_p0 = scmp.ne.s32.totalorder (!%p195_p13), %s841_s13, 0 }
  0x2d   : > { %228 = sbr.rel (%p638_p0) target bundleno = 52 (0x34), region = 73  ;;  %v859_v2 = vmov (!%p638_p0), 0.0  }
  0x2e   : > { %229 = vst [vmem:[#allocation2] sm:$0xff] (!%p638_p0), %v859_v2  ;;  %230 = vst [vmem:[#allocation2 + $0x8] sm:$0xff] (!%p638_p0), %v859_v2 }
  0x34 PF: > { %s667_s27 = sshll.u32 %s841_s13, 4  ;;  %v231_v3 = vld [vmem:[%s203_s25] sm:$0xf]  ;;  %v860_v4 = vmov 0.0   ;;  %v238_v5 = vld [vmem:[%s203_s25 + $0x4] sm:$0x1] }
  0x35   : > { %682 = vmatprep.subr.bf16.mxu0 %v860_v4  ;;  %688 = vmatprep.subr.bf16.mxu1 %v860_v4  ;;  %s235_s3 = scalar_lea.vmem %s1021_s1, %s667_s27  ;;  %v651_v6 = vld [vmem:[%s203_s25 + $0x8] sm:$0xf]  ;;  %v652_v7 = vld [vmem:[%s203_s25 + $0xc] sm:$0x1]  ;;  %vm861_vm0 = vmmov 0   ;;  %v646_v9 = vcombine.low %v231_v3, %v238_v5  ;;  %vm263_vm1 = vcmask 130048  }
  0x36   : > { %v781_v8 = vld [vmem:[%s235_s3 + $0x8] sm:$0xff]   ;;  %690 = vmatprep.mubr.msk.bf16.mxu1 %vm861_vm0, %v860_v4  ;;  %684 = vmatprep.mubr.msk.bf16.mxu0 %vm861_vm0, %v860_v4  ;;  %v655_v10 = vcombine.low %v651_v6, %v652_v7  ;;  %v782_v11 = vld [vmem:[%s235_s3] sm:$0xff]   ;;  %p660_p1 = scmp.ne.s32.totalorder %s841_s13, 1 }
  0x37   : > { %683 = vmatpush3.bf16.msra.mxu0 %v781_v8  ;;  %v251_v12 = vshrl.u32 %v646_v9, 16  ;;  %v253_v13 = vshll.u32 %v646_v9, 16  ;;  %689 = vmatpush3.bf16.msra.mxu1 %v782_v11  ;;  %v785_v15 = vld [vmem:[%s235_s3] sm:$0xff]   ;;  %v784_v17 = vld [vmem:[%s235_s3 + $0x8] sm:$0xff]  }
  0x38   : > { %694 = vmatprep.subr.bf16.mxu0 %v860_v4  ;;  %700 = vmatprep.subr.bf16.mxu1 %v860_v4  ;;  %v374_v16 = vshll.u32 %v655_v10, 16  ;;  %v372_v19 = vshrl.u32 %v655_v10, 16  ;;  %v356_v25 = vld [vmem:[#allocation2] sm:$0xff]  ;;  %v477_v36 = vld [vmem:[#allocation2 + $0x8] sm:$0xff] }
  0x39   : > { %v255_v14 = vrot.slane %v253_v13, 1 }
  0x3a   : > { %691 = vmatmul.mubr.msk.bf16.vlgmr.msra.gmra.mrb[0].mxu1 %vm263_vm1, %v231_v3  ;;  %v376_v20 = vrot.slane %v374_v16, 1 }
  0x3b   : > { %v256_v18 = vor.u32 %v255_v14, %v251_v12  ;;  %701 = vmatpush3.bf16.msra.mxu1 %v785_v15  ;;  %702 = vmatprep.mubr.msk.bf16.mxu1 %vm861_vm0, %v860_v4 }
  0x3c   : > { %v377_v21 = vor.u32 %v376_v20, %v372_v19 }
  0x3d   : > { %685 = vmatmul.mubr.msk.bf16.vlgmr.msra.gmra.mrb[0].mxu0 %vm263_vm1, %v256_v18 }
  0x3e   : > { %695 = vmatpush3.bf16.msra.mxu0 %v784_v17  ;;  %696 = vmatprep.mubr.msk.bf16.mxu0 %vm861_vm0, %v860_v4 }
  0x42   : > { %703 = vmatmul.mubr.msk.bf16.vlgmr.msra.gmra.mrb[4].mxu1 %vm263_vm1, %v651_v6 }
  0x45   : > { %697 = vmatmul.mubr.msk.bf16.vlgmr.msra.gmra.mrb[4].mxu0 %vm263_vm1, %v377_v21 }
 0x10d   : > { %v350_v22 = vpop.f32.mrb[0].mxu1 }
 0x10e   : > { %v692_v23 = vpop.f32.mrb[1].mxu1 }
 0x10f   : > { %v353_v26 = vpop.f32.mrb[2].mxu1 }
 0x110   : > { %v301_v24 = vpop.f32.mrb[0].mxu0  ;;  %v693_v29 = vpop.f32.mrb[3].mxu1 }
 0x111   : > { %v351_v27 = vadd.f32 %v350_v22, %v301_v24  ;;  %v686_v28 = vpop.f32.mrb[1].mxu0 }
 0x112   : > { %v304_v30 = vpop.f32.mrb[2].mxu0 }
 0x113   : > { %v357_v31 = vadd.f32 %v356_v25, %v351_v27  ;;  %v687_v32 = vpop.f32.mrb[3].mxu0 }
 0x115   : > { %358 = vst [vmem:[#allocation2] sm:$0xff] %v357_v31  ;;  %v470_v33 = vpop.f32.mrb[4].mxu1 }
 0x116   : > { %v704_v34 = vpop.f32.mrb[5].mxu1 }
 0x117   : > { %v473_v37 = vpop.f32.mrb[6].mxu1  ;;  %483 = sbr.rel (%p660_p1) target bundleno = 296 (0x128), region = 77 }
 0x118   : > { %v421_v35 = vpop.f32.mrb[4].mxu0  ;;  %v705_v40 = vpop.f32.mrb[7].mxu1 }
 0x119   : > { %v471_v38 = vadd.f32 %v470_v33, %v421_v35  ;;  %v698_v39 = vpop.f32.mrb[5].mxu0 }
 0x11a   : > { %v424_v41 = vpop.f32.mrb[6].mxu0 }
 0x11b   : > { %v478_v42 = vadd.f32 %v477_v36, %v471_v38  ;;  %v699_v43 = vpop.f32.mrb[7].mxu0 }
 0x11c   : > { %v484_v44 = vld [vmem:[#allocation2] sm:$0xff] (!%p660_p1) }
 0x11d   : > { %479 = vst [vmem:[#allocation2 + $0x8] sm:$0xff] %v478_v42 }
 0x124   : > { %v485_v45 = vld [vmem:[#allocation2 + $0x8] sm:$0xff] }
 0x125   : > { %v672_v46 = vpack.c.bf16 %v485_v45, %v484_v44 }
 0x127   : > { %673 = vst [vmem:[%s968_s26] sm:$0xff] %v672_v46  }
 0x128 PF: > { %496 = sbr.rel (!%p947_p9) target bundleno = 304 (0x130), region = 81  ;;  %s662_s4 = sshll.u32 (%p947_p9), %s845_s14, 2 }
 0x129   : > { %s501_s13 = scalar_lea.vmem (%p947_p9), %s1022_s2, %s662_s4 }
 0x12e   : > { %v517_v47 = vld [vmem:[%s968_s26] sm:$0xf] (%p947_p9)  ;;  %v519_v48 = vld [vmem:[%s968_s26 + $0x4] sm:$0xf] (%p947_p9) }
 0x12f   : > { %518 = vst [vmem:[%s501_s13] sm:$0xf] %v517_v47  ;;  %520 = vst [vmem:[%s501_s13 + $0x20] sm:$0xf] %v519_v48 }
 0x130 PF: > { %s12_s17 = sadd.s32 1, %s857_s17   ;;  %s1025_s9 = smov %s829_s10 }
 0x131   : > { %p9_p2 = scmp.ge.s32.totalorder %s12_s17, 18   ;;  %s1026_s10 = smov %s952_s29 }
 0x132   : > { %s1027_s11 = smov %s837_s12  ;;  %s1028_s12 = smov %s955_s30 }
 0x133   : > { %s1029_s13 = smov %s849_s15  ;;  %s1030_s14 = smov %s853_s16 }
 0x134   : > { %s1031_s15 = smov %s1034_s18  ;;  %s1032_s16 = smov %s1038_s19 }
 0x135   :  { %11 = sbr.rel (!%p9_p2) target bundleno = 5 (0x5), region = 157 }

// kernel: resblock_forward.5
= control target key start
LH: loop header
LB: loop body
LE: loop exit
PB: predicated region body
PF: predicated region fallthrough
CT: control target
= control target key end

     0   :  { %s1211_s15 = smov 0   ;;  %s1213_s16 = smov 0   ;;  %s1394_s0 = inlined_call_operand.vmem [shape: bf16[2,10,10,16], index: 0, kind: input, shape index: {}]   ;;  %s1395_s1 = inlined_call_operand.vmem [shape: bf16[9,16,128], index: 1, kind: input, shape index: {}]   ;;  %s1396_s2 = inlined_call_operand.vmem [shape: f32[1,1,128], index: 2, kind: input, shape index: {}]   ;;  %s1397_s3 = inlined_call_operand.vmem [shape: bf16[2,8,8,128], index: 3, kind: input, shape index: {}]   ;;  %s1398_s4 = inlined_call_operand.vmem [shape: bf16[2,8,8,128], index: 4, kind: output, shape index: {}]  }
   0x1   :  { %s1215_s17 = smov 0   ;;  %s1217_s18 = smov 0  }
   0x2   :  { %s1219_s19 = smov 0   ;;  %s1221_s20 = smov 0  }
   0x3   :  { %s1223_s21 = smov 0   ;;  %s1225_s22 = smov 0  }
   0x4   :  { %s1227_s23 = smov 0  }
   0x5 LB: > { %s916_s24 = sadd.s32 4294967295, %s1181_s23   ;;  %s26_s25 = sadd.s32 1, %s1173_s21  ;;  %s1181_s23 = sphi %s1227_s23, %s14_s23   ;;  %s1177_s22 = sphi %s1225_s22, %s1412_s22   ;;  %s1173_s21 = sphi %s1223_s21, %s1411_s21   ;;  %s1169_s20 = sphi %s1221_s20, %s1410_s20   ;;  %s1165_s19 = sphi %s1219_s19, %s1409_s19   ;;  %s1161_s18 = sphi %s1217_s18, %s1408_s18   ;;  %s1157_s17 = sphi %s1215_s17, %s1407_s17   ;;  %s1153_s16 = sphi %s1213_s16, %s1406_s16   ;;  %s1149_s15 = sphi %s1211_s15, %s1405_s15  }
   0x6   : > { %p27_p0 = scmp.ge.s32.totalorder %s26_s25, 3  ;;  %s29_s26 = sadd.s32 1, %s1177_s22 }
   0x7   : > { %s37_s27 = sadd.s32 %s1173_s21, %s1177_s22  ;;  %s44_s28 = sadd.s32 1, %s1161_s18 }
   0x8   : > { %s1414_s25 = smov (%p27_p0, %s26_s25), 0  ;;  %s1416_s26 = smov (!%p27_p0, %s29_s26), %s1177_s22 }
   0x9   : > { %p51_p1 = scmp.ne.s32.totalorder %s1161_s18, %s1157_s17  ;;  %p52_p2 = scmp.eq.s32.totalorder %s1181_s23, 0 }
   0xa   : > { %p31_p3 = scmp.ge.s32.totalorder %s1416_s26, 8  ;;  %s114_s29 = sadd.s32 1, %s1153_s16 }
   0xb   : > { %p1269_p4 = por %p52_p2, %p51_p1  ;;  %p121_p5 = scmp.ne.s32.totalorder %s1153_s16, %s1149_s15 }
   0xc   : > { %s1418_s26 = smov (%p31_p3, %s1416_s26), 0  ;;  %p153_p7 = scmp.eq.s32.totalorder %s916_s24, 23 }
   0xd   : > { %1401 = sst [smem:[#allocation6_spill]] %s1418_s26  ;;  %p1277_p6 = por %p121_p5, %p52_p2 }
   0xe   : > { %s38_s6 = sadd.s32 %s1418_s26, %s1414_s25  ;;  %s110_s7 = ssub.s32 %s1177_s22, %s1418_s26 }
   0xf   : > { %s40_s8 = ssub.s32 %s37_s27, %s38_s6  ;;  %p112_p8 = scmp.eq.s32.totalorder %s110_s7, 0 }
  0x10   : > { %p42_p9 = scmp.eq.s32.totalorder %s40_s8, 0  ;;  %p1285_p10 = por %p153_p7, %p121_p5 }
  0x11   : > { %s1290_s10 = scalar_select %p112_p8, %s1153_s16, %s114_s29  }
  0x12   : > { %s1293_s11 = scalar_select %p42_p9, %s1161_s18, %s44_s28  }
  0x13   : > { %p919_p11 = scmp.ge.s32.totalorder %s1181_s23, 24 }
  0x15   : > { %181 = sbr.rel (%p919_p11) target bundleno = 42 (0x2a), region = 24 }
  0x1c   : > { %184 = sbr.rel (!%p1269_p4) target bundleno = 35 (0x23), region = 28  ;;  %s186_s12 = sand.u32 (%p1269_p4), 1, %s1161_s18  }
  0x1d   : > { %s967_s13 = sshll.u32 (%p1269_p4), %s37_s27, 3  ;;  %s920_s14 = sshll.u32 (%p1269_p4), %s186_s12, 4 }
  0x1e   : > { %s195_s7 = scalar_lea.vmem (%p1269_p4), %s1394_s0, %s967_s13  ;;  %s188_s29 = scalar_lea.vmem (%p1269_p4), [#allocation3], %s920_s14 }
  0x1f   : > { %v211_v0 = vld [vmem:[%s195_s7] sm:$0xff] (%p1269_p4)   ;;  %v215_v1 = vld [vmem:[%s195_s7 + $0x50] sm:$0xff] (%p1269_p4)  }
  0x20   : > { %212 = vst [vmem:[%s188_s29] sm:$0xff] (%p1269_p4), %v211_v0   ;;  %216 = vst [vmem:[%s188_s29 + $0x8] sm:$0xff] (%p1269_p4), %v215_v1  }
  0x23 PF: > { %249 = sbr.rel (!%p1277_p6) target bundleno = 42 (0x2a), region = 69  ;;  %s251_s28 = sand.u32 (%p1277_p6), 1, %s1153_s16  }
  0x24   : > { %s924_s30 = sshll.u32 (%p1277_p6), %s1177_s22, 2  ;;  %s923_s8 = sshll.u32 (%p1277_p6), %s251_s28, 3 }
  0x25   : > { %s258_s26 = scalar_lea.vmem (%p1277_p6), %s1397_s3, %s924_s30  ;;  %s253_s13 = scalar_lea.vmem (%p1277_p6), [#allocation4], %s923_s8 }
  0x26   : > { %v274_v2 = vld [vmem:[%s258_s26] sm:$0xf] (%p1277_p6) }
  0x27   : > { %v276_v3 = vld [vmem:[%s258_s26 + $0x20] sm:$0xf] (%p1277_p6)  ;;  %275 = vst [vmem:[%s253_s13] sm:$0xf] (%p1277_p6), %v274_v2 }
  0x28   : > { %277 = vst [vmem:[%s253_s13 + $0x4] sm:$0xf] (%p1277_p6), %v276_v3 }
  0x2a PF: > { %p925_p12 = scmp.ge.s32.totalorder %s1181_s23, 1  ;;  %p303_p13 = scmp.lt.s32.totalorder %s1181_s23, 25 }
  0x2c   : > { %p304_p0 = pnand %p925_p12, %p303_p13 }
  0x2d   : > { %s310_s5 = sand.u32 (!%p304_p0), 1, %s1157_s17   ;;  %s317_s14 = sand.u32 (!%p304_p0), 1, %s1149_s15  }
  0x2e   : > { %307 = sbr.rel (%p304_p0) target bundleno = 329 (0x149), region = 110  ;;  %s926_s24 = sshll.u32 (!%p304_p0), %s310_s5, 4 }
  0x2f   : > { %s1313_s6 = sshll.u32 (!%p304_p0), %s317_s14, 3  ;;  %s1315_s26 = scalar_lea.vmem (!%p304_p0), [#allocation3], %s926_s24 }
  0x30   : > { %s319_s7 = scalar_lea.vmem (!%p304_p0), [#allocation4], %s1313_s6  ;;  %s1319_s29 = scalar_lea.vmem (!%p304_p0), [#allocation5], %s1313_s6 }
  0x31   : > { %p929_p1 = scmp.ne.s32.totalorder (!%p304_p0), %s1165_s19, 0 }
  0x35   : > { %353 = sbr.rel (%p929_p1) target bundleno = 60 (0x3c), region = 122  ;;  %v1183_v4 = vmov (!%p929_p1), 0.0  }
  0x36   : > { %354 = vst [vmem:[#allocation2] sm:$0xff] (!%p929_p1), %v1183_v4  ;;  %355 = vst [vmem:[#allocation2 + $0x8] sm:$0xff] (!%p929_p1), %v1183_v4 }
  0x3c PF: > { %s968_s15 = smul.u32 24, %s1165_s19  ;;  %v356_v5 = vld [vmem:[%s1315_s26] sm:$0xf]  ;;  %v1184_v6 = vmov 0.0   ;;  %v363_v7 = vld [vmem:[%s1315_s26 + $0x4] sm:$0x1] }
  0x3d   : > { %990 = vmatprep.subr.bf16.mxu0 %v1184_v6  ;;  %996 = vmatprep.subr.bf16.mxu1 %v1184_v6  ;;  %v946_v8 = vld [vmem:[%s1315_s26 + $0x8] sm:$0xf]  ;;  %vm1185_vm0 = vmmov 0   ;;  %v935_v9 = vcombine.low %v356_v5, %v363_v7  ;;  %v947_v10 = vld [vmem:[%s1315_s26 + $0xc] sm:$0x1]  ;;  %vm388_vm1 = vcmask 130048  }
  0x3e   : > { %s1329_s30 = scalar_lea.vmem %s1395_s1, %s968_s15  ;;  %992 = vmatprep.mubr.msk.bf16.mxu0 %vm1185_vm0, %v1184_v6  ;;  %998 = vmatprep.mubr.msk.bf16.mxu1 %vm1185_vm0, %v1184_v6  ;;  %v950_v12 = vcombine.low %v946_v8, %v947_v10  ;;  %v481_v17 = vld [vmem:[%s1315_s26] sm:$0xe]  ;;  %v955_v27 = vld [vmem:[%s1315_s26 + $0x8] sm:$0xe]  ;;  %p961_p2 = scmp.ne.s32.totalorder %s1165_s19, 2 }
  0x3f   : > { %v1101_v11 = vld [vmem:[%s1329_s30 + $0x8] sm:$0xff]   ;;  %v1102_v13 = vld [vmem:[%s1329_s30] sm:$0xff]   ;;  %v376_v14 = vshrl.u32 %v935_v9, 16  ;;  %v378_v15 = vshll.u32 %v935_v9, 16  ;;  %v1104_v19 = vld [vmem:[%s1329_s30 + $0x10] sm:$0xff]   ;;  %v943_v24 = vcombine.low %v481_v17, %v363_v7  ;;  %v958_v30 = vcombine.low %v955_v27, %v947_v10 }
  0x40   : > { %991 = vmatpush3.bf16.msra.mxu0 %v1101_v11  ;;  %997 = vmatpush3.bf16.msra.mxu1 %v1102_v13  ;;  %v1105_v16 = vld [vmem:[%s1329_s30 + $0x8] sm:$0xff]   ;;  %v560_v20 = vshll.u32 %v950_v12, 16  ;;  %v558_v22 = vshrl.u32 %v950_v12, 16  ;;  %v1109_v26 = vld [vmem:[%s1329_s30 + $0x10] sm:$0xff]   ;;  %v1108_v29 = vld [vmem:[%s1329_s30] sm:$0xff]  }
  0x41   : > { %1002 = vmatprep.subr.bf16.mxu0 %v1184_v6  ;;  %v380_v18 = vrot.slane %v378_v15, 1  ;;  %1008 = vmatprep.subr.bf16.mxu1 %v1184_v6  ;;  %v491_v28 = vrot.slane %v943_v24, 1  ;;  %v668_v31 = vrot.slane %v958_v30, 1  ;;  %v542_v44 = vld [vmem:[#allocation2] sm:$0xff]  ;;  %v720_v59 = vld [vmem:[#allocation2 + $0x8] sm:$0xff] }
  0x42   : > { %v562_v23 = vrot.slane %v560_v20, 1  ;;  %v962_v2 = vld [vmem:[%s1396_s2] ss:$0 sm:$0xff] (!%p961_p2) }
  0x43   : > { %v381_v21 = vor.u32 %v380_v18, %v376_v14  ;;  %999 = vmatmul.mubr.msk.bf16.vlgmr.msra.gmra.mrb[0].mxu1 %vm388_vm1, %v356_v5  ;;  %v970_v5 = vld [vmem:[%s319_s7] sm:$0xff] (!%p961_p2)  }
  0x44   : > { %1009 = vmatpush3.bf16.msra.mxu1 %v1105_v16  ;;  %1010 = vmatprep.mubr.msk.bf16.mxu1 %vm1185_vm0, %v1184_v6  ;;  %v563_v25 = vor.u32 %v562_v23, %v558_v22  ;;  %v972_v7 = vunpack.c.h.bf16 (!%p961_p2), %v970_v5 }
  0x45   : > { %993 = vmatmul.mubr.msk.bf16.vlgmr.msra.gmra.mrb[0].mxu0 %vm388_vm1, %v381_v21  ;;  %1020 = vmatprep.subr.bf16.mxu1 %v1184_v6 }
  0x46   : > { %1003 = vmatpush3.bf16.msra.mxu0 %v1104_v19  ;;  %1004 = vmatprep.mubr.msk.bf16.mxu0 %vm1185_vm0, %v1184_v6 }
  0x47   : > { %1014 = vmatprep.subr.bf16.mxu0 %v1184_v6 }
  0x4b   : > { %1011 = vmatmul.mubr.msk.bf16.vlgmr.msra.gmra.mrb[4].mxu1 %vm388_vm1, %v563_v25 }
  0x4c   : > { %1021 = vmatpush3.bf16.msra.mxu1 %v1109_v26  ;;  %1022 = vmatprep.mubr.msk.bf16.mxu1 %vm1185_vm0, %v1184_v6 }
  0x4d   : > { %1005 = vmatmul.mubr.msk.bf16.vlgmr.msra.gmra.mrb[4].mxu0 %vm388_vm1, %v491_v28 }
  0x4e   : > { %1015 = vmatpush3.bf16.msra.mxu0 %v1108_v29  ;;  %1016 = vmatprep.mubr.msk.bf16.mxu0 %vm1185_vm0, %v1184_v6  ;;  %v971_v6 = vunpack.c.l.bf16 (!%p961_p2), %v970_v5 }
  0x53   : > { %1023 = vmatmul.mubr.msk.bf16.vlgmr.msra.gmra.mrb[8].mxu1 %vm388_vm1, %v668_v31 }
  0x55   : > { %1017 = vmatmul.mubr.msk.bf16.vlgmr.msra.gmra.mrb[8].mxu0 %vm388_vm1, %v946_v8 }
 0x116   : > { %v475_v32 = vpop.f32.mrb[0].mxu1 }
 0x117   : > { %v1000_v33 = vpop.f32.mrb[1].mxu1 }
 0x118   : > { %v426_v34 = vpop.f32.mrb[0].mxu0  ;;  %v478_v35 = vpop.f32.mrb[2].mxu1 }
 0x119   : > { %v476_v36 = vadd.f32 %v475_v32, %v426_v34  ;;  %v994_v37 = vpop.f32.mrb[1].mxu0  ;;  %v1001_v38 = vpop.f32.mrb[3].mxu1 }
 0x11a   : > { %v429_v39 = vpop.f32.mrb[2].mxu0 }
 0x11b   : > { %v995_v40 = vpop.f32.mrb[3].mxu0 }
 0x11e   : > { %v607_v41 = vpop.f32.mrb[4].mxu1 }
 0x11f   : > { %v1012_v42 = vpop.f32.mrb[5].mxu1 }
 0x120   : > { %v535_v43 = vpop.f32.mrb[4].mxu0  ;;  %v610_v45 = vpop.f32.mrb[6].mxu1 }
 0x121   : > { %v541_v46 = vadd.f32 %v535_v43, %v476_v36  ;;  %v1006_v47 = vpop.f32.mrb[5].mxu0  ;;  %v1013_v48 = vpop.f32.mrb[7].mxu1 }
 0x122   : > { %v538_v49 = vpop.f32.mrb[6].mxu0 }
 0x123   : > { %v543_v50 = vadd.f32 %v542_v44, %v541_v46  ;;  %v1007_v51 = vpop.f32.mrb[7].mxu0 }
 0x125   : > { %544 = vst [vmem:[#allocation2] sm:$0xff] %v543_v50 }
 0x126   : > { %v712_v52 = vpop.f32.mrb[8].mxu1 }
 0x127   : > { %v1024_v53 = vpop.f32.mrb[9].mxu1 }
 0x128   : > { %v656_v54 = vpop.f32.mrb[8].mxu0  ;;  %v715_v55 = vpop.f32.mrb[10].mxu1 }
 0x129   : > { %v657_v56 = vadd.f32 %v656_v54, %v607_v41  ;;  %v1018_v57 = vpop.f32.mrb[9].mxu0  ;;  %v1025_v58 = vpop.f32.mrb[11].mxu1  ;;  %726 = sbr.rel (%p961_p2) target bundleno = 321 (0x141), region = 126 }
 0x12a   : > { %v659_v60 = vpop.f32.mrb[10].mxu0 }
 0x12b   : > { %v718_v61 = vadd.f32 %v712_v52, %v657_v56  ;;  %v1019_v62 = vpop.f32.mrb[11].mxu0 }
 0x12c   : > { %v727_v0 = vld [vmem:[#allocation2] sm:$0xff] (!%p961_p2) }
 0x12d   : > { %v721_v63 = vadd.f32 %v720_v59, %v718_v61  ;;  %v736_v3 = vadd.f32 (!%p961_p2), %v962_v2, %v727_v0 }
 0x12f   : > { %722 = vst [vmem:[#allocation2 + $0x8] sm:$0xff] %v721_v63  ;;  %vm738_vm2 = vcmp.ge.f32.partialorder (!%p961_p2), %v736_v3, 0.0  ;;  %v740_v8 = vmul.f32 (!%p961_p2), 0.2, %v736_v3 }
 0x131   : > { %v742_v10 = vsel %vm738_vm2, %v736_v3, %v740_v8 }
 0x132   : > { %v748_v12 = vadd.f32 %v971_v6, %v742_v10 }
 0x136   : > { %v728_v1 = vld [vmem:[#allocation2 + $0x8] sm:$0xff] }
 0x137   : > { %v737_v4 = vadd.f32 %v962_v2, %v728_v1 }
 0x139   : > { %vm739_vm3 = vcmp.ge.f32.partialorder %v737_v4, 0.0  ;;  %v741_v9 = vmul.f32 0.2, %v737_v4 }
 0x13b   : > { %v743_v11 = vsel %vm739_vm3, %v737_v4, %v741_v9 }
 0x13c   : > { %v749_v13 = vadd.f32 %v972_v7, %v743_v11 }
 0x13e   : > { %v976_v14 = vpack.c.bf16 %v749_v13, %v748_v12 }
 0x140   : > { %977 = vst [vmem:[%s1319_s29] sm:$0xff] %v976_v14  }
 0x141 PF: > { %760 = sbr.rel (!%p1285_p10) target bundleno = 329 (0x149), region = 130  ;;  %s964_s19 = sshll.u32 (%p1285_p10), %s1169_s20, 2 }
 0x142   : > { %s765_s5 = scalar_lea.vmem (%p1285_p10), %s1398_s4, %s964_s19 }
 0x147   : > { %v781_v15 = vld [vmem:[%s1319_s29] sm:$0xf] (%p1285_p10)  ;;  %v783_v16 = vld [vmem:[%s1319_s29 + $0x4] sm:$0xf] (%p1285_p10) }
 0x148   : > { %782 = vst [vmem:[%s765_s5] sm:$0xf] %v781_v15  ;;  %784 = vst [vmem:[%s765_s5 + $0x20] sm:$0xf] %v783_v16 }
 0x149 PF: > { %s14_s23 = sadd.s32 1, %s1181_s23   ;;  %s1404_s9 = sld [smem:[#allocation6_spill]] }
 0x14a   : > { %p11_p3 = scmp.ge.s32.totalorder %s14_s23, 26   ;;  %s1405_s15 = smov %s1153_s16 }
 0x14b   : > { %s1406_s16 = smov %s1290_s10  ;;  %s1407_s17 = smov %s1161_s18 }
 0x14c   : > { %s1408_s18 = smov %s1293_s11  ;;  %s1409_s19 = smov %s1173_s21 }
 0x14d   : > { %s1410_s20 = smov %s1177_s22  ;;  %s1411_s21 = smov %s1414_s25 }
 0x14e   :  { %13 = sbr.rel (!%p11_p3) target bundleno = 5 (0x5), region = 215 }
 0x14f   : > { %s1412_s22 = smov %s1404_s9 }

</bundles_post_ra>
